<compile_context>
chip_gen: v6e
topology: v6e:2x2x1
jax: 0.10.0
libtpu: 0.0.40
codegen_flags: <defaults>
</compile_context>

<pallas_src>
import functools

import jax
import jax.numpy as jnp
from jax.experimental import pallas as pl
from jax.experimental.pallas import tpu as pltpu


# ------------------------------ layout helpers --------------------------------


def _einshape(eq, x):
    """Lane-layout-aware transpose when available, jnp.transpose otherwise."""
    if hasattr(pltpu, "einshape"):
        return pltpu.einshape(eq, x)
    src, dst = eq.split("->")
    perm = tuple(src.index(c) for c in dst)
    return jnp.transpose(x, perm)


def _split_heads(x, block_b, seq, heads, dim_head, dtype):
    """(block_b*seq, heads*dim_head) f32 -> (block_b*heads, seq, dim_head)."""
    x = x.astype(dtype)
    if block_b == 1:
        x = x.reshape(seq, heads, dim_head)
        return _einshape("nhd->hnd", x)                      # (H, N, dh)
    x = x.reshape(block_b, seq, heads, dim_head)
    x = _einshape("bnhd->bhnd", x)                           # (B, H, N, dh)
    return x.reshape(block_b * heads, seq, dim_head)


def _merge_heads(x, block_b, seq, heads, dim_head):
    """(block_b*heads, seq, dim_head) -> (block_b*seq, heads*dim_head)."""
    if block_b == 1:
        x = _einshape("hnd->nhd", x)                         # (N, H, dh)
        return x.reshape(seq, heads * dim_head)
    x = x.reshape(block_b, heads, seq, dim_head)
    x = _einshape("bhnd->bnhd", x)                           # (B, N, H, dh)
    return x.reshape(block_b * seq, heads * dim_head)


# ------------------------------- Pallas kernel --------------------------------


def _prenorm_attn_kernel(
    q_ref, k_ref, v_ref,          # (rows, D) flattened (batch*seq) row blocks
    gamma_ref, beta_ref,          # (1, D)   LayerNorm affine params
    wq_ref, wk_ref, wv_ref,       # (D, inner)
    wo_ref,                       # (inner, D)
    bo_ref,                       # (1, D)
    o_ref,                        # (rows, D) output block
    *, block_b, seq, heads, dim_head, eps,
):
    f32 = jnp.float32
    cdtype = wq_ref.dtype          # MXU operand dtype (bf16 if the model is bf16)
    scale = float(dim_head) ** -0.5

    gamma = gamma_ref[...].astype(f32)     # (1, D), broadcasts over rows
    beta = beta_ref[...].astype(f32)

    def layernorm(x, g, b):                # (rows, D) -> (rows, D) in cdtype
        xf = x.astype(f32)
        mean = jnp.mean(xf, axis=-1, keepdims=True)
        mean_sq = jnp.mean(xf * xf, axis=-1, keepdims=True)
        var = mean_sq - mean * mean        # single-pass stats (eps guards)
        inv = jax.lax.rsqrt(var + eps)
        return ((xf - mean) * inv * g + b).astype(cdtype)

    # 1/sqrt(dh) folded into q's LayerNorm affine -> Q comes out pre-scaled.
    qn = layernorm(q_ref[...], gamma * scale, beta * scale)
    kn = layernorm(k_ref[...], gamma, beta)
    vn = layernorm(v_ref[...], gamma, beta)

    # Flat QKV projections over all rows: MXU-shaped matmuls, f32 accumulation.
    Q = jnp.dot(qn, wq_ref[...], preferred_element_type=f32)   # (rows, inner)
    K = jnp.dot(kn, wk_ref[...], preferred_element_type=f32)
    V = jnp.dot(vn, wv_ref[...], preferred_element_type=f32)

    # One head-major relayout per operand, then the whole block's attention as
    # a single batched matmul pair over z = block_b*heads.
    Qh = _split_heads(Q, block_b, seq, heads, dim_head, cdtype)   # (z, N, dh)
    Kh = _split_heads(K, block_b, seq, heads, dim_head, cdtype)
    Vh = _split_heads(V, block_b, seq, heads, dim_head, cdtype)

    # TODO(synk): for long sequences (N >~ 512) tile over the kv axis with an
    # online softmax instead of materializing the full (z, N, N) score tensor.
    s = jnp.einsum("znd,zmd->znm", Qh, Kh, preferred_element_type=f32)
    s = s - jnp.max(s, axis=-1, keepdims=True)
    p = jnp.exp(s)
    p = p * pl.reciprocal(jnp.sum(p, axis=-1, keepdims=True), approx=True)
    oh = jnp.einsum("znm,zmd->znd", p.astype(cdtype), Vh,
                    preferred_element_type=f32)                    # (z, N, dh)

    attn = _merge_heads(oh, block_b, seq, heads, dim_head).astype(cdtype)

    # Output projection + bias + residual (q re-read late, no long-lived copy).
    out = jnp.dot(attn, wo_ref[...], preferred_element_type=f32)   # (rows, D)
    out = out + bo_ref[...].astype(f32) + q_ref[...].astype(f32)
    o_ref[...] = out.astype(o_ref.dtype)


# --------------------------------- wrapper ------------------------------------


def _vmem_budget_bytes():
    try:
        cap = int(pltpu.get_tpu_info().vmem_capacity_bytes)
    except Exception:
        cap = 128 * 1024 * 1024
    # v7x (64 MiB) -> 48 MiB scoped; v5e/v6e (128 MiB) -> 96 MiB, capped.
    return min(int(cap * 3 // 4), 100 * 1024 * 1024)


def _pick_block_b(B, N, D, inner, heads, itemsize, vmem_budget):
    def est_bytes(bb):
        rows = bb * N
        io = 4 * 2 * rows * D * itemsize                 # q,k,v,out double-buffered
        w = (3 * D * inner + inner * D + 3 * D) * itemsize
        qkv = 3 * rows * inner * 4                       # f32 Q,K,V
        scores = bb * heads * N * N * 4                  # f32 attention scores
        attn_out = rows * inner * 4
        return io + w + qkv + scores + attn_out

    divisors = [bb for bb in range(1, B + 1) if B % bb == 0]
    # flattened (rows, D) blocks need an 8-aligned sublane dim unless they
    # span the whole array.
    aligned = [bb for bb in divisors if (bb * N) % 8 == 0 or bb == B]
    if not aligned:
        aligned = [B]
    fitting = [bb for bb in aligned if est_bytes(bb) <= 0.6 * vmem_budget]
    cands = fitting or [min(aligned)]
    # Keep >= 2 grid steps when possible (v7x has 2 TensorCores on the
    # "parallel" axis); then target >= 512 / 256 rows per step for MXU fill.
    pref = [bb for bb in cands if B // bb >= 2] or cands
    for target_rows in (512, 256):
        hit = [bb for bb in pref if bb * N >= target_rows]
        if hit:
            return min(hit)
    return max(pref)


def prenorm_attention_qkv(q, k, v, params, *, heads, dim_head, eps=1e-5):
    """q, k, v: (B, N, D) arrays. Returns (B, N, D)."""
    B, N, D = q.shape
    inner = heads * dim_head

    vmem_limit = _vmem_budget_bytes()
    itemsize = q.dtype.itemsize
    block_b = _pick_block_b(B, N, D, inner, heads, itemsize, vmem_limit)
    rows = block_b * N
    grid = B // block_b

    # Flatten (B, N) outside the kernel (free XLA reshape) -> 2-D row blocks.
    q2 = q.reshape(B * N, D)
    k2 = k.reshape(B * N, D)
    v2 = v.reshape(B * N, D)
    gamma = params["gamma"].reshape(1, D)
    beta = params["beta"].reshape(1, D)
    bo = params["bo"].reshape(1, D)

    kernel = functools.partial(
        _prenorm_attn_kernel,
        block_b=block_b, seq=N, heads=heads, dim_head=dim_head, eps=eps,
    )

    def build(single_buffer_weights):
        row_spec = pl.BlockSpec((rows, D), lambda i: (i, 0))

        def const_spec(shape):
            idx = lambda i: (0,) * len(shape)
            if single_buffer_weights and hasattr(pl, "Buffered"):
                # Constant index_map -> double-buffering is pure VMEM waste.
                return pl.BlockSpec(shape, idx, pipeline_mode=pl.Buffered(1))
            return pl.BlockSpec(shape, idx)

        return pl.pallas_call(
            kernel,
            out_shape=jax.ShapeDtypeStruct((B * N, D), q.dtype),
            grid_spec=pltpu.PrefetchScalarGridSpec(
                num_scalar_prefetch=0,
                grid=(grid,),
                in_specs=[
                    row_spec, row_spec, row_spec,          # q, k, v
                    const_spec((1, D)), const_spec((1, D)),   # gamma, beta
                    const_spec((D, inner)), const_spec((D, inner)),  # wq, wk
                    const_spec((D, inner)),                # wv
                    const_spec((inner, D)),                # wo
                    const_spec((1, D)),                    # bo
                ],
                out_specs=row_spec,
            ),
            compiler_params=pltpu.CompilerParams(
                dimension_semantics=("parallel",),
                vmem_limit_bytes=vmem_limit,
            ),
        )

    args = (q2, k2, v2, gamma, beta,
            params["wq"], params["wk"], params["wv"], params["wo"], bo)
    try:
        out2 = build(True)(*args)
    except Exception:
        # Single-buffered weight blocks are an optimization only; fall back to
        # default double-buffering if pipeline_mode isn't supported.
        out2 = build(False)(*args)
    return out2.reshape(B, N, D)


# ----------------------------- pure-JAX reference ------------------------------


def _reference(q, k, v, params, *, heads, dim_head, eps=1e-5):
    def ln(x):
        mean = jnp.mean(x, axis=-1, keepdims=True)
        var = jnp.mean((x - mean) ** 2, axis=-1, keepdims=True)
        return (x - mean) / jnp.sqrt(var + eps) * params["gamma"] + params["beta"]

    qn, kn, vn = ln(q), ln(k), ln(v)
    Q = jnp.einsum("bnd,de->bne", qn, params["wq"])
    K = jnp.einsum("bnd,de->bne", kn, params["wk"])
    V = jnp.einsum("bnd,de->bne", vn, params["wv"])

    def split(x):  # (B, N, H*dh) -> (B, H, N, dh)
        B, N, _ = x.shape
        return x.reshape(B, N, heads, dim_head).transpose(0, 2, 1, 3)

    Qh, Kh, Vh = split(Q), split(K), split(V)
    s = jnp.einsum("bhnd,bhmd->bhnm", Qh, Kh) * (dim_head ** -0.5)
    p = jax.nn.softmax(s, axis=-1)
    o = jnp.einsum("bhnm,bhmd->bhnd", p, Vh)
    B, H, N, dh = o.shape
    o = o.transpose(0, 2, 1, 3).reshape(B, N, H * dh)
    o = jnp.einsum("bne,ed->bnd", o, params["wo"]) + params["bo"]
    return o + q


# ------------------------------------ main -------------------------------------


if __name__ == "__main__":
    B, N, D = 2, 8, 32
    heads, dim_head = 4, 8
    inner = heads * dim_head

    key = jax.random.PRNGKey(0)
    ks = jax.random.split(key, 8)

    q = jax.random.normal(ks[0], (B, N, D), dtype=jnp.float32)
    k = jax.random.normal(ks[1], (B, N, D), dtype=jnp.float32)
    v = jax.random.normal(ks[2], (B, N, D), dtype=jnp.float32)

    params = {
        "gamma": jnp.ones((D,), jnp.float32),
        "beta": jnp.zeros((D,), jnp.float32),
        "wq": jax.random.normal(ks[3], (D, inner), jnp.float32) * 0.05,
        "wk": jax.random.normal(ks[4], (D, inner), jnp.float32) * 0.05,
        "wv": jax.random.normal(ks[5], (D, inner), jnp.float32) * 0.05,
        "wo": jax.random.normal(ks[6], (inner, D), jnp.float32) * 0.05,
        "bo": jax.random.normal(ks[7], (D,), jnp.float32) * 0.05,
    }

    out = prenorm_attention_qkv(q, k, v, params, heads=heads, dim_head=dim_head)
    out = jax.block_until_ready(out)

    ref = _reference(q, k, v, params, heads=heads, dim_head=dim_head)
    assert out.shape == (B, N, D)
    # Tolerance accounts for the approximate (EUP) softmax reciprocal and the
    # single-pass variance form.
    assert jnp.allclose(out, ref, atol=5e-3, rtol=5e-3), (
        float(jnp.max(jnp.abs(out - ref)))
    )
    print("KERNEL_OK")
</pallas_src>

<mosaic_0001>
module attributes {stable_mosaic.version = 11 : i64} {
  func.func @_prenorm_attn_kernel(%arg0: i32, %arg1: memref<8x32xf32, #tpu.memory_space<vmem>>, %arg2: memref<8x32xf32, #tpu.memory_space<vmem>>, %arg3: memref<8x32xf32, #tpu.memory_space<vmem>>, %arg4: memref<1x32xf32, #tpu.memory_space<vmem>>, %arg5: memref<1x32xf32, #tpu.memory_space<vmem>>, %arg6: memref<32x32xf32, #tpu.memory_space<vmem>>, %arg7: memref<32x32xf32, #tpu.memory_space<vmem>>, %arg8: memref<32x32xf32, #tpu.memory_space<vmem>>, %arg9: memref<32x32xf32, #tpu.memory_space<vmem>>, %arg10: memref<1x32xf32, #tpu.memory_space<vmem>>, %arg11: memref<8x32xf32, #tpu.memory_space<vmem>>) attributes {dimension_semantics = [#tpu.dimension_semantics<parallel>], iteration_bounds = array<i64: 2>, scalar_prefetch = 0 : i64, scratch_operands = 0 : i64, tpu.core_type = #tpu.core_type<tc>, window_params = [{transform_indices = @transform_0, window_bounds = array<i64: 8, 32>}, {transform_indices = @transform_1, window_bounds = array<i64: 8, 32>}, {transform_indices = @transform_2, window_bounds = array<i64: 8, 32>}, {pipeline_mode = #tpu.pipeline_mode<synchronous>, transform_indices = @transform_3, window_bounds = array<i64: 1, 32>}, {pipeline_mode = #tpu.pipeline_mode<synchronous>, transform_indices = @transform_4, window_bounds = array<i64: 1, 32>}, {pipeline_mode = #tpu.pipeline_mode<synchronous>, transform_indices = @transform_5, window_bounds = array<i64: 32, 32>}, {pipeline_mode = #tpu.pipeline_mode<synchronous>, transform_indices = @transform_6, window_bounds = array<i64: 32, 32>}, {pipeline_mode = #tpu.pipeline_mode<synchronous>, transform_indices = @transform_7, window_bounds = array<i64: 32, 32>}, {pipeline_mode = #tpu.pipeline_mode<synchronous>, transform_indices = @transform_8, window_bounds = array<i64: 32, 32>}, {pipeline_mode = #tpu.pipeline_mode<synchronous>, transform_indices = @transform_9, window_bounds = array<i64: 1, 32>}, {transform_indices = @transform_10, window_bounds = array<i64: 8, 32>}]} {
    %c0 = arith.constant 0 : index
    %c0_0 = arith.constant 0 : index
    %0 = vector.load %arg4[%c0, %c0_0] : memref<1x32xf32, #tpu.memory_space<vmem>>, vector<1x32xf32>
    %c0_1 = arith.constant 0 : index
    %c0_2 = arith.constant 0 : index
    %1 = vector.load %arg5[%c0_1, %c0_2] : memref<1x32xf32, #tpu.memory_space<vmem>>, vector<1x32xf32>
    %c0_3 = arith.constant 0 : index
    %c0_4 = arith.constant 0 : index
    %2 = vector.load %arg1[%c0_3, %c0_4] : memref<8x32xf32, #tpu.memory_space<vmem>>, vector<8x32xf32>
    %cst = arith.constant 0.353553385 : f32
    %3 = vector.broadcast %cst : f32 to vector<1x32xf32>
    %4 = arith.mulf %0, %3 : vector<1x32xf32>
    %cst_5 = arith.constant 0.353553385 : f32
    %5 = vector.broadcast %cst_5 : f32 to vector<1x32xf32>
    %6 = arith.mulf %1, %5 : vector<1x32xf32>
    %cst_6 = arith.constant dense<0.000000e+00> : vector<8xf32>
    %7 = vector.multi_reduction <add>, %2, %cst_6 [1] : vector<8x32xf32> to vector<8xf32>
    %8 = vector.shape_cast %7 : vector<8xf32> to vector<8x1xf32>
    %cst_7 = arith.constant 3.200000e+01 : f32
    %9 = vector.broadcast %cst_7 : f32 to vector<8x1xf32>
    %10 = arith.divf %8, %9 : vector<8x1xf32>
    %11 = arith.mulf %2, %2 : vector<8x32xf32>
    %cst_8 = arith.constant dense<0.000000e+00> : vector<8xf32>
    %12 = vector.multi_reduction <add>, %11, %cst_8 [1] : vector<8x32xf32> to vector<8xf32>
    %13 = vector.shape_cast %12 : vector<8xf32> to vector<8x1xf32>
    %cst_9 = arith.constant 3.200000e+01 : f32
    %14 = vector.broadcast %cst_9 : f32 to vector<8x1xf32>
    %15 = arith.divf %13, %14 : vector<8x1xf32>
    %16 = arith.mulf %10, %10 : vector<8x1xf32>
    %17 = arith.subf %15, %16 : vector<8x1xf32>
    %cst_10 = arith.constant 9.99999974E-6 : f32
    %18 = vector.broadcast %cst_10 : f32 to vector<8x1xf32>
    %19 = arith.addf %17, %18 : vector<8x1xf32>
    %20 = math.rsqrt %19 : vector<8x1xf32>
    %21 = vector.broadcast %10 : vector<8x1xf32> to vector<8x32xf32>
    %22 = arith.subf %2, %21 : vector<8x32xf32>
    %23 = vector.broadcast %20 : vector<8x1xf32> to vector<8x32xf32>
    %24 = arith.mulf %22, %23 : vector<8x32xf32>
    %25 = vector.broadcast %4 : vector<1x32xf32> to vector<8x32xf32>
    %26 = arith.mulf %24, %25 : vector<8x32xf32>
    %27 = vector.broadcast %6 : vector<1x32xf32> to vector<8x32xf32>
    %28 = arith.addf %26, %27 : vector<8x32xf32>
    %c0_11 = arith.constant 0 : index
    %c0_12 = arith.constant 0 : index
    %29 = vector.load %arg2[%c0_11, %c0_12] : memref<8x32xf32, #tpu.memory_space<vmem>>, vector<8x32xf32>
    %cst_13 = arith.constant dense<0.000000e+00> : vector<8xf32>
    %30 = vector.multi_reduction <add>, %29, %cst_13 [1] : vector<8x32xf32> to vector<8xf32>
    %31 = vector.shape_cast %30 : vector<8xf32> to vector<8x1xf32>
    %cst_14 = arith.constant 3.200000e+01 : f32
    %32 = vector.broadcast %cst_14 : f32 to vector<8x1xf32>
    %33 = arith.divf %31, %32 : vector<8x1xf32>
    %34 = arith.mulf %29, %29 : vector<8x32xf32>
    %cst_15 = arith.constant dense<0.000000e+00> : vector<8xf32>
    %35 = vector.multi_reduction <add>, %34, %cst_15 [1] : vector<8x32xf32> to vector<8xf32>
    %36 = vector.shape_cast %35 : vector<8xf32> to vector<8x1xf32>
    %cst_16 = arith.constant 3.200000e+01 : f32
    %37 = vector.broadcast %cst_16 : f32 to vector<8x1xf32>
    %38 = arith.divf %36, %37 : vector<8x1xf32>
    %39 = arith.mulf %33, %33 : vector<8x1xf32>
    %40 = arith.subf %38, %39 : vector<8x1xf32>
    %cst_17 = arith.constant 9.99999974E-6 : f32
    %41 = vector.broadcast %cst_17 : f32 to vector<8x1xf32>
    %42 = arith.addf %40, %41 : vector<8x1xf32>
    %43 = math.rsqrt %42 : vector<8x1xf32>
    %44 = vector.broadcast %33 : vector<8x1xf32> to vector<8x32xf32>
    %45 = arith.subf %29, %44 : vector<8x32xf32>
    %46 = vector.broadcast %43 : vector<8x1xf32> to vector<8x32xf32>
    %47 = arith.mulf %45, %46 : vector<8x32xf32>
    %48 = vector.broadcast %0 : vector<1x32xf32> to vector<8x32xf32>
    %49 = arith.mulf %47, %48 : vector<8x32xf32>
    %50 = vector.broadcast %1 : vector<1x32xf32> to vector<8x32xf32>
    %51 = arith.addf %49, %50 : vector<8x32xf32>
    %c0_18 = arith.constant 0 : index
    %c0_19 = arith.constant 0 : index
    %52 = vector.load %arg3[%c0_18, %c0_19] : memref<8x32xf32, #tpu.memory_space<vmem>>, vector<8x32xf32>
    %cst_20 = arith.constant dense<0.000000e+00> : vector<8xf32>
    %53 = vector.multi_reduction <add>, %52, %cst_20 [1] : vector<8x32xf32> to vector<8xf32>
    %54 = vector.shape_cast %53 : vector<8xf32> to vector<8x1xf32>
    %cst_21 = arith.constant 3.200000e+01 : f32
    %55 = vector.broadcast %cst_21 : f32 to vector<8x1xf32>
    %56 = arith.divf %54, %55 : vector<8x1xf32>
    %57 = arith.mulf %52, %52 : vector<8x32xf32>
    %cst_22 = arith.constant dense<0.000000e+00> : vector<8xf32>
    %58 = vector.multi_reduction <add>, %57, %cst_22 [1] : vector<8x32xf32> to vector<8xf32>
    %59 = vector.shape_cast %58 : vector<8xf32> to vector<8x1xf32>
    %cst_23 = arith.constant 3.200000e+01 : f32
    %60 = vector.broadcast %cst_23 : f32 to vector<8x1xf32>
    %61 = arith.divf %59, %60 : vector<8x1xf32>
    %62 = arith.mulf %56, %56 : vector<8x1xf32>
    %63 = arith.subf %61, %62 : vector<8x1xf32>
    %cst_24 = arith.constant 9.99999974E-6 : f32
    %64 = vector.broadcast %cst_24 : f32 to vector<8x1xf32>
    %65 = arith.addf %63, %64 : vector<8x1xf32>
    %66 = math.rsqrt %65 : vector<8x1xf32>
    %67 = vector.broadcast %56 : vector<8x1xf32> to vector<8x32xf32>
    %68 = arith.subf %52, %67 : vector<8x32xf32>
    %69 = vector.broadcast %66 : vector<8x1xf32> to vector<8x32xf32>
    %70 = arith.mulf %68, %69 : vector<8x32xf32>
    %71 = vector.broadcast %0 : vector<1x32xf32> to vector<8x32xf32>
    %72 = arith.mulf %70, %71 : vector<8x32xf32>
    %73 = vector.broadcast %1 : vector<1x32xf32> to vector<8x32xf32>
    %74 = arith.addf %72, %73 : vector<8x32xf32>
    %c0_25 = arith.constant 0 : index
    %c0_26 = arith.constant 0 : index
    %75 = vector.load %arg6[%c0_25, %c0_26] : memref<32x32xf32, #tpu.memory_space<vmem>>, vector<32x32xf32>
    %cst_27 = arith.constant dense<0.000000e+00> : vector<8x32xf32>
    %76 = tpu.matmul %28, %75, %cst_27 {dimension_numbers = #tpu.dot_dimension_numbers<[1], [0], [0], [1], [0, 0, 1, 1], [], []>} : vector<8x32xf32>, vector<32x32xf32>, vector<8x32xf32> -> vector<8x32xf32>
    %c0_28 = arith.constant 0 : index
    %c0_29 = arith.constant 0 : index
    %77 = vector.load %arg7[%c0_28, %c0_29] : memref<32x32xf32, #tpu.memory_space<vmem>>, vector<32x32xf32>
    %cst_30 = arith.constant dense<0.000000e+00> : vector<8x32xf32>
    %78 = tpu.matmul %51, %77, %cst_30 {dimension_numbers = #tpu.dot_dimension_numbers<[1], [0], [0], [1], [0, 0, 1, 1], [], []>} : vector<8x32xf32>, vector<32x32xf32>, vector<8x32xf32> -> vector<8x32xf32>
    %c0_31 = arith.constant 0 : index
    %c0_32 = arith.constant 0 : index
    %79 = vector.load %arg8[%c0_31, %c0_32] : memref<32x32xf32, #tpu.memory_space<vmem>>, vector<32x32xf32>
    %cst_33 = arith.constant dense<0.000000e+00> : vector<8x32xf32>
    %80 = tpu.matmul %74, %79, %cst_33 {dimension_numbers = #tpu.dot_dimension_numbers<[1], [0], [0], [1], [0, 0, 1, 1], [], []>} : vector<8x32xf32>, vector<32x32xf32>, vector<8x32xf32> -> vector<8x32xf32>
    %81 = vector.shape_cast %76 : vector<8x32xf32> to vector<8x4x8xf32>
    %82 = tpu.transpose %81, [1, 0, 2] : vector<8x4x8xf32> -> vector<4x8x8xf32>
    %83 = vector.shape_cast %78 : vector<8x32xf32> to vector<8x4x8xf32>
    %84 = tpu.transpose %83, [1, 0, 2] : vector<8x4x8xf32> -> vector<4x8x8xf32>
    %85 = vector.shape_cast %80 : vector<8x32xf32> to vector<8x4x8xf32>
    %86 = tpu.transpose %85, [1, 0, 2] : vector<8x4x8xf32> -> vector<4x8x8xf32>
    "tpu.trace_start"() <{level = 10 : i32, message = "znd,zmd->znm"}> : () -> ()
    %cst_34 = arith.constant dense<0.000000e+00> : vector<4x8x8xf32>
    %87 = tpu.matmul %82, %84, %cst_34 {dimension_numbers = #tpu.dot_dimension_numbers<[2], [2], [1], [1], [0, 0, 0, 1, 1, 1], [0], [0]>} : vector<4x8x8xf32>, vector<4x8x8xf32>, vector<4x8x8xf32> -> vector<4x8x8xf32>
    "tpu.trace_stop"() : () -> ()
    %cst_35 = arith.constant dense<0xFF800000> : vector<4x8xf32>
    %88 = vector.multi_reduction <maximumf>, %87, %cst_35 [2] : vector<4x8x8xf32> to vector<4x8xf32>
    %89 = vector.shape_cast %88 : vector<4x8xf32> to vector<4x8x1xf32>
    %90 = vector.broadcast %89 : vector<4x8x1xf32> to vector<4x8x8xf32>
    %91 = arith.subf %87, %90 : vector<4x8x8xf32>
    %92 = math.exp %91 : vector<4x8x8xf32>
    %cst_36 = arith.constant dense<0.000000e+00> : vector<4x8xf32>
    %93 = vector.multi_reduction <add>, %92, %cst_36 [2] : vector<4x8x8xf32> to vector<4x8xf32>
    %94 = vector.shape_cast %93 : vector<4x8xf32> to vector<4x8x1xf32>
    %95 = tpu.reciprocal %94 {approx = true} : vector<4x8x1xf32> -> vector<4x8x1xf32>
    %96 = vector.broadcast %95 : vector<4x8x1xf32> to vector<4x8x8xf32>
    %97 = arith.mulf %92, %96 : vector<4x8x8xf32>
    "tpu.trace_start"() <{level = 10 : i32, message = "znm,zmd->znd"}> : () -> ()
    %cst_37 = arith.constant dense<0.000000e+00> : vector<4x8x8xf32>
    %98 = tpu.matmul %97, %86, %cst_37 {dimension_numbers = #tpu.dot_dimension_numbers<[2], [1], [1], [2], [0, 0, 0, 1, 1, 2], [0], [0]>} : vector<4x8x8xf32>, vector<4x8x8xf32>, vector<4x8x8xf32> -> vector<4x8x8xf32>
    "tpu.trace_stop"() : () -> ()
    %99 = tpu.transpose %98, [1, 0, 2] : vector<4x8x8xf32> -> vector<8x4x8xf32>
    %100 = vector.shape_cast %99 : vector<8x4x8xf32> to vector<8x32xf32>
    %c0_38 = arith.constant 0 : index
    %c0_39 = arith.constant 0 : index
    %101 = vector.load %arg9[%c0_38, %c0_39] : memref<32x32xf32, #tpu.memory_space<vmem>>, vector<32x32xf32>
    %cst_40 = arith.constant dense<0.000000e+00> : vector<8x32xf32>
    %102 = tpu.matmul %100, %101, %cst_40 {dimension_numbers = #tpu.dot_dimension_numbers<[1], [0], [0], [1], [0, 0, 1, 1], [], []>} : vector<8x32xf32>, vector<32x32xf32>, vector<8x32xf32> -> vector<8x32xf32>
    %c0_41 = arith.constant 0 : index
    %c0_42 = arith.constant 0 : index
    %103 = vector.load %arg10[%c0_41, %c0_42] : memref<1x32xf32, #tpu.memory_space<vmem>>, vector<1x32xf32>
    %104 = vector.broadcast %103 : vector<1x32xf32> to vector<8x32xf32>
    %105 = arith.addf %102, %104 : vector<8x32xf32>
    %c0_43 = arith.constant 0 : index
    %c0_44 = arith.constant 0 : index
    %106 = vector.load %arg1[%c0_43, %c0_44] : memref<8x32xf32, #tpu.memory_space<vmem>>, vector<8x32xf32>
    %107 = arith.addf %105, %106 : vector<8x32xf32>
    %c0_45 = arith.constant 0 : index
    %c0_46 = arith.constant 0 : index
    %108 = vector.load %arg11[%c0_45, %c0_46] : memref<8x32xf32, #tpu.memory_space<vmem>>, vector<8x32xf32>
    tpu.vector_store %arg11[%c0_45, %c0_46], %107 {strides = array<i32>} : memref<8x32xf32, #tpu.memory_space<vmem>>, vector<8x32xf32>,
    return
  }
  func.func @transform_0(%arg0: i32) -> (i32, i32) {
    %c0_i32 = arith.constant 0 : i32
    %c0_i32_0 = arith.constant 0 : i32
    return %arg0, %c0_i32 : i32, i32
  }
  func.func @transform_1(%arg0: i32) -> (i32, i32) {
    %c0_i32 = arith.constant 0 : i32
    %c0_i32_0 = arith.constant 0 : i32
    return %arg0, %c0_i32 : i32, i32
  }
  func.func @transform_2(%arg0: i32) -> (i32, i32) {
    %c0_i32 = arith.constant 0 : i32
    %c0_i32_0 = arith.constant 0 : i32
    return %arg0, %c0_i32 : i32, i32
  }
  func.func @transform_3(%arg0: i32) -> (i32, i32) {
    %c0_i32 = arith.constant 0 : i32
    %c0_i32_0 = arith.constant 0 : i32
    %c0_i32_1 = arith.constant 0 : i32
    return %c0_i32, %c0_i32_0 : i32, i32
  }
  func.func @transform_4(%arg0: i32) -> (i32, i32) {
    %c0_i32 = arith.constant 0 : i32
    %c0_i32_0 = arith.constant 0 : i32
    %c0_i32_1 = arith.constant 0 : i32
    return %c0_i32, %c0_i32_0 : i32, i32
  }
  func.func @transform_5(%arg0: i32) -> (i32, i32) {
    %c0_i32 = arith.constant 0 : i32
    %c0_i32_0 = arith.constant 0 : i32
    %c0_i32_1 = arith.constant 0 : i32
    return %c0_i32, %c0_i32_0 : i32, i32
  }
  func.func @transform_6(%arg0: i32) -> (i32, i32) {
    %c0_i32 = arith.constant 0 : i32
    %c0_i32_0 = arith.constant 0 : i32
    %c0_i32_1 = arith.constant 0 : i32
    return %c0_i32, %c0_i32_0 : i32, i32
  }
  func.func @transform_7(%arg0: i32) -> (i32, i32) {
    %c0_i32 = arith.constant 0 : i32
    %c0_i32_0 = arith.constant 0 : i32
    %c0_i32_1 = arith.constant 0 : i32
    return %c0_i32, %c0_i32_0 : i32, i32
  }
  func.func @transform_8(%arg0: i32) -> (i32, i32) {
    %c0_i32 = arith.constant 0 : i32
    %c0_i32_0 = arith.constant 0 : i32
    %c0_i32_1 = arith.constant 0 : i32
    return %c0_i32, %c0_i32_0 : i32, i32
  }
  func.func @transform_9(%arg0: i32) -> (i32, i32) {
    %c0_i32 = arith.constant 0 : i32
    %c0_i32_0 = arith.constant 0 : i32
    %c0_i32_1 = arith.constant 0 : i32
    return %c0_i32, %c0_i32_0 : i32, i32
  }
  func.func @transform_10(%arg0: i32) -> (i32, i32) {
    %c0_i32 = arith.constant 0 : i32
    %c0_i32_0 = arith.constant 0 : i32
    return %arg0, %c0_i32 : i32, i32
  }
}

module attributes {stable_mosaic.version = 11 : i64} {
  func.func @_prenorm_attn_kernel(%arg0: i32, %arg1: memref<8x32xf32, #tpu.memory_space<vmem>>, %arg2: memref<8x32xf32, #tpu.memory_space<vmem>>, %arg3: memref<8x32xf32, #tpu.memory_space<vmem>>, %arg4: memref<1x32xf32, #tpu.memory_space<vmem>>, %arg5: memref<1x32xf32, #tpu.memory_space<vmem>>, %arg6: memref<32x32xf32, #tpu.memory_space<vmem>>, %arg7: memref<32x32xf32, #tpu.memory_space<vmem>>, %arg8: memref<32x32xf32, #tpu.memory_space<vmem>>, %arg9: memref<32x32xf32, #tpu.memory_space<vmem>>, %arg10: memref<1x32xf32, #tpu.memory_space<vmem>>, %arg11: memref<8x32xf32, #tpu.memory_space<vmem>>) attributes {dimension_semantics = [#tpu.dimension_semantics<parallel>], iteration_bounds = array<i64: 2>, scalar_prefetch = 0 : i64, scratch_operands = 0 : i64, tpu.core_type = #tpu.core_type<tc>, window_params = [{transform_indices = @transform_0, window_bounds = array<i64: 8, 32>}, {transform_indices = @transform_1, window_bounds = array<i64: 8, 32>}, {transform_indices = @transform_2, window_bounds = array<i64: 8, 32>}, {pipeline_mode = #tpu.pipeline_mode<synchronous>, transform_indices = @transform_3, window_bounds = array<i64: 1, 32>}, {pipeline_mode = #tpu.pipeline_mode<synchronous>, transform_indices = @transform_4, window_bounds = array<i64: 1, 32>}, {pipeline_mode = #tpu.pipeline_mode<synchronous>, transform_indices = @transform_5, window_bounds = array<i64: 32, 32>}, {pipeline_mode = #tpu.pipeline_mode<synchronous>, transform_indices = @transform_6, window_bounds = array<i64: 32, 32>}, {pipeline_mode = #tpu.pipeline_mode<synchronous>, transform_indices = @transform_7, window_bounds = array<i64: 32, 32>}, {pipeline_mode = #tpu.pipeline_mode<synchronous>, transform_indices = @transform_8, window_bounds = array<i64: 32, 32>}, {pipeline_mode = #tpu.pipeline_mode<synchronous>, transform_indices = @transform_9, window_bounds = array<i64: 1, 32>}, {transform_indices = @transform_10, window_bounds = array<i64: 8, 32>}]} {
    %c0 = arith.constant 0 : index
    %c0_0 = arith.constant 0 : index
    %0 = vector.load %arg4[%c0, %c0_0] : memref<1x32xf32, #tpu.memory_space<vmem>>, vector<1x32xf32>
    %c0_1 = arith.constant 0 : index
    %c0_2 = arith.constant 0 : index
    %1 = vector.load %arg5[%c0_1, %c0_2] : memref<1x32xf32, #tpu.memory_space<vmem>>, vector<1x32xf32>
    %c0_3 = arith.constant 0 : index
    %c0_4 = arith.constant 0 : index
    %2 = vector.load %arg1[%c0_3, %c0_4] : memref<8x32xf32, #tpu.memory_space<vmem>>, vector<8x32xf32>
    %cst = arith.constant 0.353553385 : f32
    %3 = vector.broadcast %cst : f32 to vector<1x32xf32>
    %4 = arith.mulf %0, %3 : vector<1x32xf32>
    %cst_5 = arith.constant 0.353553385 : f32
    %5 = vector.broadcast %cst_5 : f32 to vector<1x32xf32>
    %6 = arith.mulf %1, %5 : vector<1x32xf32>
    %cst_6 = arith.constant dense<0.000000e+00> : vector<8xf32>
    %7 = vector.multi_reduction <add>, %2, %cst_6 [1] : vector<8x32xf32> to vector<8xf32>
    %8 = vector.shape_cast %7 : vector<8xf32> to vector<8x1xf32>
    %cst_7 = arith.constant 3.200000e+01 : f32
    %9 = vector.broadcast %cst_7 : f32 to vector<8x1xf32>
    %10 = arith.divf %8, %9 : vector<8x1xf32>
    %11 = arith.mulf %2, %2 : vector<8x32xf32>
    %cst_8 = arith.constant dense<0.000000e+00> : vector<8xf32>
    %12 = vector.multi_reduction <add>, %11, %cst_8 [1] : vector<8x32xf32> to vector<8xf32>
    %13 = vector.shape_cast %12 : vector<8xf32> to vector<8x1xf32>
    %cst_9 = arith.constant 3.200000e+01 : f32
    %14 = vector.broadcast %cst_9 : f32 to vector<8x1xf32>
    %15 = arith.divf %13, %14 : vector<8x1xf32>
    %16 = arith.mulf %10, %10 : vector<8x1xf32>
    %17 = arith.subf %15, %16 : vector<8x1xf32>
    %cst_10 = arith.constant 9.99999974E-6 : f32
    %18 = vector.broadcast %cst_10 : f32 to vector<8x1xf32>
    %19 = arith.addf %17, %18 : vector<8x1xf32>
    %20 = math.rsqrt %19 : vector<8x1xf32>
    %21 = vector.broadcast %10 : vector<8x1xf32> to vector<8x32xf32>
    %22 = arith.subf %2, %21 : vector<8x32xf32>
    %23 = vector.broadcast %20 : vector<8x1xf32> to vector<8x32xf32>
    %24 = arith.mulf %22, %23 : vector<8x32xf32>
    %25 = vector.broadcast %4 : vector<1x32xf32> to vector<8x32xf32>
    %26 = arith.mulf %24, %25 : vector<8x32xf32>
    %27 = vector.broadcast %6 : vector<1x32xf32> to vector<8x32xf32>
    %28 = arith.addf %26, %27 : vector<8x32xf32>
    %c0_11 = arith.constant 0 : index
    %c0_12 = arith.constant 0 : index
    %29 = vector.load %arg2[%c0_11, %c0_12] : memref<8x32xf32, #tpu.memory_space<vmem>>, vector<8x32xf32>
    %cst_13 = arith.constant dense<0.000000e+00> : vector<8xf32>
    %30 = vector.multi_reduction <add>, %29, %cst_13 [1] : vector<8x32xf32> to vector<8xf32>
    %31 = vector.shape_cast %30 : vector<8xf32> to vector<8x1xf32>
    %cst_14 = arith.constant 3.200000e+01 : f32
    %32 = vector.broadcast %cst_14 : f32 to vector<8x1xf32>
    %33 = arith.divf %31, %32 : vector<8x1xf32>
    %34 = arith.mulf %29, %29 : vector<8x32xf32>
    %cst_15 = arith.constant dense<0.000000e+00> : vector<8xf32>
    %35 = vector.multi_reduction <add>, %34, %cst_15 [1] : vector<8x32xf32> to vector<8xf32>
    %36 = vector.shape_cast %35 : vector<8xf32> to vector<8x1xf32>
    %cst_16 = arith.constant 3.200000e+01 : f32
    %37 = vector.broadcast %cst_16 : f32 to vector<8x1xf32>
    %38 = arith.divf %36, %37 : vector<8x1xf32>
    %39 = arith.mulf %33, %33 : vector<8x1xf32>
    %40 = arith.subf %38, %39 : vector<8x1xf32>
    %cst_17 = arith.constant 9.99999974E-6 : f32
    %41 = vector.broadcast %cst_17 : f32 to vector<8x1xf32>
    %42 = arith.addf %40, %41 : vector<8x1xf32>
    %43 = math.rsqrt %42 : vector<8x1xf32>
    %44 = vector.broadcast %33 : vector<8x1xf32> to vector<8x32xf32>
    %45 = arith.subf %29, %44 : vector<8x32xf32>
    %46 = vector.broadcast %43 : vector<8x1xf32> to vector<8x32xf32>
    %47 = arith.mulf %45, %46 : vector<8x32xf32>
    %48 = vector.broadcast %0 : vector<1x32xf32> to vector<8x32xf32>
    %49 = arith.mulf %47, %48 : vector<8x32xf32>
    %50 = vector.broadcast %1 : vector<1x32xf32> to vector<8x32xf32>
    %51 = arith.addf %49, %50 : vector<8x32xf32>
    %c0_18 = arith.constant 0 : index
    %c0_19 = arith.constant 0 : index
    %52 = vector.load %arg3[%c0_18, %c0_19] : memref<8x32xf32, #tpu.memory_space<vmem>>, vector<8x32xf32>
    %cst_20 = arith.constant dense<0.000000e+00> : vector<8xf32>
    %53 = vector.multi_reduction <add>, %52, %cst_20 [1] : vector<8x32xf32> to vector<8xf32>
    %54 = vector.shape_cast %53 : vector<8xf32> to vector<8x1xf32>
    %cst_21 = arith.constant 3.200000e+01 : f32
    %55 = vector.broadcast %cst_21 : f32 to vector<8x1xf32>
    %56 = arith.divf %54, %55 : vector<8x1xf32>
    %57 = arith.mulf %52, %52 : vector<8x32xf32>
    %cst_22 = arith.constant dense<0.000000e+00> : vector<8xf32>
    %58 = vector.multi_reduction <add>, %57, %cst_22 [1] : vector<8x32xf32> to vector<8xf32>
    %59 = vector.shape_cast %58 : vector<8xf32> to vector<8x1xf32>
    %cst_23 = arith.constant 3.200000e+01 : f32
    %60 = vector.broadcast %cst_23 : f32 to vector<8x1xf32>
    %61 = arith.divf %59, %60 : vector<8x1xf32>
    %62 = arith.mulf %56, %56 : vector<8x1xf32>
    %63 = arith.subf %61, %62 : vector<8x1xf32>
    %cst_24 = arith.constant 9.99999974E-6 : f32
    %64 = vector.broadcast %cst_24 : f32 to vector<8x1xf32>
    %65 = arith.addf %63, %64 : vector<8x1xf32>
    %66 = math.rsqrt %65 : vector<8x1xf32>
    %67 = vector.broadcast %56 : vector<8x1xf32> to vector<8x32xf32>
    %68 = arith.subf %52, %67 : vector<8x32xf32>
    %69 = vector.broadcast %66 : vector<8x1xf32> to vector<8x32xf32>
    %70 = arith.mulf %68, %69 : vector<8x32xf32>
    %71 = vector.broadcast %0 : vector<1x32xf32> to vector<8x32xf32>
    %72 = arith.mulf %70, %71 : vector<8x32xf32>
    %73 = vector.broadcast %1 : vector<1x32xf32> to vector<8x32xf32>
    %74 = arith.addf %72, %73 : vector<8x32xf32>
    %c0_25 = arith.constant 0 : index
    %c0_26 = arith.constant 0 : index
    %75 = vector.load %arg6[%c0_25, %c0_26] : memref<32x32xf32, #tpu.memory_space<vmem>>, vector<32x32xf32>
    %cst_27 = arith.constant dense<0.000000e+00> : vector<8x32xf32>
    %76 = tpu.matmul %28, %75, %cst_27 {dimension_numbers = #tpu.dot_dimension_numbers<[1], [0], [0], [1], [0, 0, 1, 1], [], []>} : vector<8x32xf32>, vector<32x32xf32>, vector<8x32xf32> -> vector<8x32xf32>
    %c0_28 = arith.constant 0 : index
    %c0_29 = arith.constant 0 : index
    %77 = vector.load %arg7[%c0_28, %c0_29] : memref<32x32xf32, #tpu.memory_space<vmem>>, vector<32x32xf32>
    %cst_30 = arith.constant dense<0.000000e+00> : vector<8x32xf32>
    %78 = tpu.matmul %51, %77, %cst_30 {dimension_numbers = #tpu.dot_dimension_numbers<[1], [0], [0], [1], [0, 0, 1, 1], [], []>} : vector<8x32xf32>, vector<32x32xf32>, vector<8x32xf32> -> vector<8x32xf32>
    %c0_31 = arith.constant 0 : index
    %c0_32 = arith.constant 0 : index
    %79 = vector.load %arg8[%c0_31, %c0_32] : memref<32x32xf32, #tpu.memory_space<vmem>>, vector<32x32xf32>
    %cst_33 = arith.constant dense<0.000000e+00> : vector<8x32xf32>
    %80 = tpu.matmul %74, %79, %cst_33 {dimension_numbers = #tpu.dot_dimension_numbers<[1], [0], [0], [1], [0, 0, 1, 1], [], []>} : vector<8x32xf32>, vector<32x32xf32>, vector<8x32xf32> -> vector<8x32xf32>
    %81 = vector.shape_cast %76 : vector<8x32xf32> to vector<8x4x8xf32>
    %82 = tpu.transpose %81, [1, 0, 2] : vector<8x4x8xf32> -> vector<4x8x8xf32>
    %83 = vector.shape_cast %78 : vector<8x32xf32> to vector<8x4x8xf32>
    %84 = tpu.transpose %83, [1, 0, 2] : vector<8x4x8xf32> -> vector<4x8x8xf32>
    %85 = vector.shape_cast %80 : vector<8x32xf32> to vector<8x4x8xf32>
    %86 = tpu.transpose %85, [1, 0, 2] : vector<8x4x8xf32> -> vector<4x8x8xf32>
    "tpu.trace_start"() <{level = 10 : i32, message = "znd,zmd->znm"}> : () -> ()
    %cst_34 = arith.constant dense<0.000000e+00> : vector<4x8x8xf32>
    %87 = tpu.matmul %82, %84, %cst_34 {dimension_numbers = #tpu.dot_dimension_numbers<[2], [2], [1], [1], [0, 0, 0, 1, 1, 1], [0], [0]>} : vector<4x8x8xf32>, vector<4x8x8xf32>, vector<4x8x8xf32> -> vector<4x8x8xf32>
    "tpu.trace_stop"() : () -> ()
    %cst_35 = arith.constant dense<0xFF800000> : vector<4x8xf32>
    %88 = vector.multi_reduction <maximumf>, %87, %cst_35 [2] : vector<4x8x8xf32> to vector<4x8xf32>
    %89 = vector.shape_cast %88 : vector<4x8xf32> to vector<4x8x1xf32>
    %90 = vector.broadcast %89 : vector<4x8x1xf32> to vector<4x8x8xf32>
    %91 = arith.subf %87, %90 : vector<4x8x8xf32>
    %92 = math.exp %91 : vector<4x8x8xf32>
    %cst_36 = arith.constant dense<0.000000e+00> : vector<4x8xf32>
    %93 = vector.multi_reduction <add>, %92, %cst_36 [2] : vector<4x8x8xf32> to vector<4x8xf32>
    %94 = vector.shape_cast %93 : vector<4x8xf32> to vector<4x8x1xf32>
    %95 = tpu.reciprocal %94 {approx = true} : vector<4x8x1xf32> -> vector<4x8x1xf32>
    %96 = vector.broadcast %95 : vector<4x8x1xf32> to vector<4x8x8xf32>
    %97 = arith.mulf %92, %96 : vector<4x8x8xf32>
    "tpu.trace_start"() <{level = 10 : i32, message = "znm,zmd->znd"}> : () -> ()
    %cst_37 = arith.constant dense<0.000000e+00> : vector<4x8x8xf32>
    %98 = tpu.matmul %97, %86, %cst_37 {dimension_numbers = #tpu.dot_dimension_numbers<[2], [1], [1], [2], [0, 0, 0, 1, 1, 2], [0], [0]>} : vector<4x8x8xf32>, vector<4x8x8xf32>, vector<4x8x8xf32> -> vector<4x8x8xf32>
    "tpu.trace_stop"() : () -> ()
    %99 = tpu.transpose %98, [1, 0, 2] : vector<4x8x8xf32> -> vector<8x4x8xf32>
    %100 = vector.shape_cast %99 : vector<8x4x8xf32> to vector<8x32xf32>
    %c0_38 = arith.constant 0 : index
    %c0_39 = arith.constant 0 : index
    %101 = vector.load %arg9[%c0_38, %c0_39] : memref<32x32xf32, #tpu.memory_space<vmem>>, vector<32x32xf32>
    %cst_40 = arith.constant dense<0.000000e+00> : vector<8x32xf32>
    %102 = tpu.matmul %100, %101, %cst_40 {dimension_numbers = #tpu.dot_dimension_numbers<[1], [0], [0], [1], [0, 0, 1, 1], [], []>} : vector<8x32xf32>, vector<32x32xf32>, vector<8x32xf32> -> vector<8x32xf32>
    %c0_41 = arith.constant 0 : index
    %c0_42 = arith.constant 0 : index
    %103 = vector.load %arg10[%c0_41, %c0_42] : memref<1x32xf32, #tpu.memory_space<vmem>>, vector<1x32xf32>
    %104 = vector.broadcast %103 : vector<1x32xf32> to vector<8x32xf32>
    %105 = arith.addf %102, %104 : vector<8x32xf32>
    %c0_43 = arith.constant 0 : index
    %c0_44 = arith.constant 0 : index
    %106 = vector.load %arg1[%c0_43, %c0_44] : memref<8x32xf32, #tpu.memory_space<vmem>>, vector<8x32xf32>
    %107 = arith.addf %105, %106 : vector<8x32xf32>
    %c0_45 = arith.constant 0 : index
    %c0_46 = arith.constant 0 : index
    %108 = vector.load %arg11[%c0_45, %c0_46] : memref<8x32xf32, #tpu.memory_space<vmem>>, vector<8x32xf32>
    tpu.vector_store %arg11[%c0_45, %c0_46], %107 {strides = array<i32>} : memref<8x32xf32, #tpu.memory_space<vmem>>, vector<8x32xf32>,
    return
  }
  func.func @transform_0(%arg0: i32) -> (i32, i32) {
    %c0_i32 = arith.constant 0 : i32
    %c0_i32_0 = arith.constant 0 : i32
    return %arg0, %c0_i32 : i32, i32
  }
  func.func @transform_1(%arg0: i32) -> (i32, i32) {
    %c0_i32 = arith.constant 0 : i32
    %c0_i32_0 = arith.constant 0 : i32
    return %arg0, %c0_i32 : i32, i32
  }
  func.func @transform_2(%arg0: i32) -> (i32, i32) {
    %c0_i32 = arith.constant 0 : i32
    %c0_i32_0 = arith.constant 0 : i32
    return %arg0, %c0_i32 : i32, i32
  }
  func.func @transform_3(%arg0: i32) -> (i32, i32) {
    %c0_i32 = arith.constant 0 : i32
    %c0_i32_0 = arith.constant 0 : i32
    %c0_i32_1 = arith.constant 0 : i32
    return %c0_i32, %c0_i32_0 : i32, i32
  }
  func.func @transform_4(%arg0: i32) -> (i32, i32) {
    %c0_i32 = arith.constant 0 : i32
    %c0_i32_0 = arith.constant 0 : i32
    %c0_i32_1 = arith.constant 0 : i32
    return %c0_i32, %c0_i32_0 : i32, i32
  }
  func.func @transform_5(%arg0: i32) -> (i32, i32) {
    %c0_i32 = arith.constant 0 : i32
    %c0_i32_0 = arith.constant 0 : i32
    %c0_i32_1 = arith.constant 0 : i32
    return %c0_i32, %c0_i32_0 : i32, i32
  }
  func.func @transform_6(%arg0: i32) -> (i32, i32) {
    %c0_i32 = arith.constant 0 : i32
    %c0_i32_0 = arith.constant 0 : i32
    %c0_i32_1 = arith.constant 0 : i32
    return %c0_i32, %c0_i32_0 : i32, i32
  }
  func.func @transform_7(%arg0: i32) -> (i32, i32) {
    %c0_i32 = arith.constant 0 : i32
    %c0_i32_0 = arith.constant 0 : i32
    %c0_i32_1 = arith.constant 0 : i32
    return %c0_i32, %c0_i32_0 : i32, i32
  }
  func.func @transform_8(%arg0: i32) -> (i32, i32) {
    %c0_i32 = arith.constant 0 : i32
    %c0_i32_0 = arith.constant 0 : i32
    %c0_i32_1 = arith.constant 0 : i32
    return %c0_i32, %c0_i32_0 : i32, i32
  }
  func.func @transform_9(%arg0: i32) -> (i32, i32) {
    %c0_i32 = arith.constant 0 : i32
    %c0_i32_0 = arith.constant 0 : i32
    %c0_i32_1 = arith.constant 0 : i32
    return %c0_i32, %c0_i32_0 : i32, i32
  }
  func.func @transform_10(%arg0: i32) -> (i32, i32) {
    %c0_i32 = arith.constant 0 : i32
    %c0_i32_0 = arith.constant 0 : i32
    return %arg0, %c0_i32 : i32, i32
  }
}

</mosaic_0001>

<bundles_post_ra>
// kernel: tpu_custom_call.1
= control target key start
LH: loop header
LB: loop body
LE: loop exit
PB: predicated region body
PF: predicated region fallthrough
CT: control target
= control target key end

     0   :  { %s3444_s0 = inlined_call_operand.hbm [shape: f32[16,32], index: 0, kind: input, shape index: {}]   ;;  %s3445_s1 = inlined_call_operand.hbm [shape: f32[16,32], index: 1, kind: input, shape index: {}]   ;;  %s3446_s2 = inlined_call_operand.hbm [shape: f32[16,32], index: 2, kind: input, shape index: {}]   ;;  %s3447_s3 = inlined_call_operand.vmem [shape: f32[1,32], index: 3, kind: input, shape index: {}]   ;;  %s3448_s4 = inlined_call_operand.vmem [shape: f32[1,32], index: 4, kind: input, shape index: {}]   ;;  %s3449_s5 = inlined_call_operand.hbm [shape: f32[32,32], index: 5, kind: input, shape index: {}]   ;;  %s3450_s6 = inlined_call_operand.hbm [shape: f32[32,32], index: 6, kind: input, shape index: {}]   ;;  %s3451_s7 = inlined_call_operand.hbm [shape: f32[32,32], index: 7, kind: input, shape index: {}]   ;;  %s3452_s8 = inlined_call_operand.hbm [shape: f32[32,32], index: 8, kind: input, shape index: {}]   ;;  %s3453_s9 = inlined_call_operand.vmem [shape: f32[1,32], index: 9, kind: input, shape index: {}]   ;;  %s3454_s10 = inlined_call_operand.hbm [shape: f32[16,32], index: 10, kind: output, shape index: {}]  }
   0x1   :  { %3475 = sst [smem:[#allocation25_spill]] %s3444_s0 }
   0x2   :  { %3476 = sst [smem:[#allocation26_spill]] %s3445_s1 }
   0x3   :  { %3477 = sst [smem:[#allocation27_spill]] %s3449_s5 }
   0x4   :  { %3478 = sst [smem:[#allocation28_spill]] %s3451_s7 }
   0x5   :  { %3479 = sst [smem:[#allocation29_spill]] %s3454_s10 }
   0x6   :  { %15 = vsyncpa [#allocation3], 0 }
   0x7   :  { %17 = vsyncpa [#allocation3 + $0x1], 0 }
   0x8   :  { %18 = vsyncpa [#allocation6], 0 }
   0x9   :  { %20 = vsyncpa [#allocation6 + $0x1], 0 }
   0xa   :  { %21 = vsyncpa [#allocation9], 0 }
   0xb   :  { %22 = vsyncpa [#allocation12], 0 }
   0xc   :  { %23 = vsyncpa [#allocation4], 0 }
   0xd   :  { %25 = vsyncpa [#allocation4 + $0x1], 0  ;;  %s2946_s13 = smov 0   ;;  %s2948_s14 = smov 0  }
   0xe   :  { %s2950_s15 = smov 0   ;;  %s2952_s16 = smov 0  }
   0xf LB: > { %3480 = sst [smem:[#allocation20_spill]] %s2857_s13  ;;  %s2871_s17 = smov [#allocation8]   ;;  %s2869_s16 = sphi %s2952_s16, %s3516_s16   ;;  %s2865_s15 = sphi %s2950_s15, %s3520_s15   ;;  %s2861_s14 = sphi %s2948_s14, %s3519_s14   ;;  %s2857_s13 = sphi %s2946_s13, %s3518_s13  }
  0x10   : > { %3481 = sst [smem:[#allocation21_spill]] %s2869_s16  ;;  %s305_s18 = sshll.u32 %s2871_s17, 4  ;;  %s306_s18 = int_to_ptr.vmem [resolvable:$true] %s305_s18 }
  0x11   : > { %s2967_s19 = sadd.s32 4294967295, %s2869_s16   ;;  %p2304_p0 = scmp.ge.s32.totalorder %s2869_s16, 1 }
  0x12   : > { %p3467_p1 = scmp.eq.s32.totalorder %s2967_s19, 0  ;;  %p287_p2 = scmp.lt.s32.totalorder %s2869_s16, 3 }
  0x13   : > { %s2872_s21 = smov [#allocation11]   ;;  %s2616_s24 = scalar_lea.vmem %s306_s18, 512 }
  0x14   : > { %p2972_p3 = pnand %p2304_p0, %p287_p2  ;;  %s331_s22 = sshll.u32 %s2872_s21, 4  ;;  %s332_s22 = int_to_ptr.vmem [resolvable:$true] %s331_s22 }
  0x15   : > { %p2617_p8 = scmp.ne.s32.totalorder %s306_s18, %s2616_s24  ;;  %p2624_p11 = scmp.lt.s32.totalorder %s306_s18, %s306_s18 }
  0x16   : > { %s3482_s20 = scalar_select %p2972_p3, 1, 0 }
  0x17   : > { %p2498_p5 = pneg %p2972_p3  ;;  %p2625_p12 = scmp.lt.s32.totalorder %s2616_s24, %s2616_s24 }
  0x19   : > { %p2981_p6 = pnand %p2498_p5, %p3467_p1  ;;  %p2626_p13 = por %p2625_p12, %p2624_p11 }
  0x1b   : > { %s3483_s23 = scalar_select %p2981_p6, 1, 0 }
  0x1c   : > { %p3455_p7 = pneg %p2981_p6 }
  0x1e   : > { %p2619_p9 = pnand %p2617_p8, %p3455_p7 }
  0x20   : > { %p2620_p10 = pneg %p2619_p9 }
  0x22   : > { %p2627_p0 = pnand %p2626_p13, %p2620_p10 }
  0x24   : > { %2630 = shalt.err (!%p2627_p0)
}
  0x25   : > { %s3456_s25 = smov 128   ;;  %s3458_s26 = smov 8  }
  0x26   : > { %s3484_s5 = sld [smem:[#allocation27_spill]]  ;;  %s2642_s29 = scalar_lea.vmem %s332_s22, 512 }
  0x27   : > { %p2643_p2 = scmp.ne.s32.totalorder %s332_s22, %s2642_s29  ;;  %p2650_p9 = scmp.lt.s32.totalorder %s332_s22, %s332_s22 }
  0x28   : > { %p2651_p10 = scmp.lt.s32.totalorder %s2642_s29, %s2642_s29 }
  0x29   : > { %p2645_p5 = pnand %p2643_p2, %p3455_p7 }
  0x2a   : > { %p2652_p11 = por %p2651_p10, %p2650_p9 }
  0x2b   : > { %p2646_p8 = pneg %p2645_p5 }
  0x2c   : > { %2501 = dma.hbm_to_vmem [thread:$0]  (!%p2981_p6), %s3484_s5, 512, %s306_s18, [#allocation9], %s3456_s25, %s3456_s25, %s3458_s26  }
  0x2d   : > { %p2653_p12 = pnand %p2652_p11, %p2646_p8 }
  0x2f   : > { %2656 = shalt.err (!%p2653_p12)
}
  0x30   : > { %s3485_s7 = sld [smem:[#allocation28_spill]]  ;;  %s2303_s12 = sadd.s32 4294967294, %s2869_s16  }
  0x31   : > { %s3011_s17 = sadd.s32 1, %s2869_s16   ;;  %s38_s21 = sadd.s32 1, %s2865_s15 }
  0x32   : > { %3486 = sst [smem:[#allocation22_spill]] %s3011_s17  ;;  %s35_s18 = ssub.s32 %s2869_s16, %s3011_s17 }
  0x33   : > { %p36_p13 = scmp.eq.s32.totalorder %s35_s18, 0  ;;  %p45_p0 = scmp.ne.s32.totalorder %s2865_s15, %s2861_s14 }
  0x34   : > { %p46_p2 = scmp.eq.s32.totalorder %s2869_s16, 0  ;;  %p51_p5 = scmp.ne.s32.totalorder %s2861_s14, %s2857_s13 }
  0x35   : > { %s3022_s24 = scalar_select %p36_p13, %s2865_s15, %s38_s21  }
  0x36   : > { %2507 = dma.hbm_to_vmem [thread:$0]  (!%p2981_p6), %s3485_s7, 512, %s332_s22, [#allocation12], %s3456_s25, %s3456_s25, %s3458_s26  }
  0x37   : > { %3487 = sst [smem:[#allocation23_spill]] %s3022_s24  ;;  %p47_p8 = por %p46_p2, %p45_p0 }
  0x38   : > { %p3026_p9 = por %p3467_p1, %p51_p5  ;;  %p274_p10 = scmp.eq.s32.totalorder %s2967_s19, 1 }
  0x39   : > { %p280_p11 = scmp.eq.s32.totalorder %s2303_s12, 1  ;;  %p2529_p12 = scmp.lt.s32.totalorder %s2869_s16, 2 }
  0x3a   : > { %s3488_s27 = scalar_select %p3026_p9, 1, 0 }
  0x3b   : > { %s3460_s22 = sand.u32 1, %s2865_s15   ;;  %p3033_p4 = por %p274_p10, %p45_p0 }
  0x3c   : > { %p3037_p7 = por %p280_p11, %p51_p5  ;;  %s3043_s30 = sshll.u32 %s3460_s22, 3 }
  0x3d   : > { %s3489_s28 = scalar_select %p3033_p4, 1, 0 }
  0x3e   : > { %s3490_s29 = scalar_select %p3037_p7, 1, 0 }
  0x3f   : > { %s3046_s11 = sshll.u32 %s2869_s16, 7  ;;  %p3048_p13 = pnand %p2529_p12, %p47_p8 }
  0x40   : > { %3491 = sst [smem:[#allocation24_spill]] %s3490_s29  ;;  %s379_s12 = sand.u32 1, %s2869_s16  }
  0x41   : > { %s3493_s1 = sld [smem:[#allocation26_spill]]  ;;  %s383_s22 = scalar_lea.vmem [#allocation5], %s3043_s30 }
  0x42   : > { %s390_s5 = sshll.u32 %s383_s22, 4  ;;  %s2875_s7 = smov [#allocation10]   ;;  %s3060_s5 = int_to_ptr.vmem [resolvable:$true] %s390_s5 }
  0x43   : > { %s318_s24 = sshll.u32 %s2875_s7, 4  ;;  %s3062_s17 = scalar_lea.sflag [#allocation6], %s379_s12  ;;  %s319_s24 = int_to_ptr.vmem [resolvable:$true] %s318_s24 }
  0x44   : > { %p3068_p2 = pneg %p3048_p13 }
  0x46   : > { %s3494_s16 = scalar_select %p3068_p2, 1, 0 }
  0x47   : > { %s3057_s26 = scalar_lea.hbm %s3493_s1, %s3046_s11  ;;  %s2662_s22 = scalar_lea.hbm %s3493_s1, 256 }
  0x48   : > { %s2657_s29 = scalar_lea.hbm %s3057_s26, 128  ;;  %p2663_p10 = scmp.lt.s32.totalorder %s3057_s26, %s3493_s1 }
  0x49   : > { %p2658_p0 = scmp.ne.s32.totalorder %s3057_s26, %s2657_s29  ;;  %p2664_p11 = scmp.lt.s32.totalorder %s2662_s22, %s2657_s29 }
  0x4b   : > { %p2660_p5 = pnand %p3068_p2, %p2658_p0  ;;  %p2665_p12 = por %p2664_p11, %p2663_p10 }
  0x4d   : > { %p2661_p8 = pneg %p2660_p5 }
  0x4f   : > { %p2666_p1 = pnand %p2665_p12, %p2661_p8 }
  0x51   : > { %2669 = shalt.err (!%p2666_p1)
}
  0x52   : > { %s2670_s7 = scalar_lea.vmem %s3060_s5, 128  ;;  %s2876_s12 = smov [#allocation5]  }
  0x53   : > { %p2671_p7 = scmp.ne.s32.totalorder %s3060_s5, %s2670_s7  ;;  %s2675_s25 = sshll.u32 %s2876_s12, 4  ;;  %s2676_s25 = int_to_ptr.vmem [resolvable:$false] %s2675_s25 }
  0x54   : > { %s2677_s21 = scalar_lea.vmem %s2676_s25, 256  ;;  %p2678_p4 = scmp.lt.s32.totalorder %s3060_s5, %s2676_s25 }
  0x55   : > { %p2673_p0 = pnand %p2671_p7, %p3068_p2  ;;  %p2679_p9 = scmp.lt.s32.totalorder %s2677_s21, %s2670_s7 }
  0x57   : > { %p2674_p5 = pneg %p2673_p0  ;;  %p2680_p3 = por %p2679_p9, %p2678_p4 }
  0x59   : > { %p2681_p6 = pnand %p2680_p3, %p2674_p5 }
  0x5b   : > { %2684 = shalt.err (!%p2681_p6)
}
  0x5c   : > { %2517 = dma.hbm_to_vmem [thread:$0]  (!%p3048_p13), %s3057_s26, 128, %s3060_s5, %s3062_s17  }
  0x5d   : > { %s2696_s10 = scalar_lea.vmem %s319_s24, 512  ;;  %p3495_p7 = scmp.ne.s32.totalorder %s3483_s23, 0 }
  0x5e   : > { %p2697_p1 = scmp.ne.s32.totalorder %s319_s24, %s2696_s10  ;;  %p2704_p12 = scmp.lt.s32.totalorder %s319_s24, %s319_s24 }
  0x5f   : > { %p3496_p8 = pneg %p3495_p7  ;;  %p2705_p0 = scmp.lt.s32.totalorder %s2696_s10, %s2696_s10 }
  0x61   : > { %p2699_p10 = pnand %p2697_p1, %p3496_p8  ;;  %p2706_p2 = por %p2705_p0, %p2704_p12 }
  0x63   : > { %p2700_p11 = pneg %p2699_p10 }
  0x65   : > { %p2707_p4 = pnand %p2706_p2, %p2700_p11 }
  0x67   : > { %2710 = shalt.err (!%p2707_p4)
}
  0x68   : > { %s3497_s13 = smov 8   ;;  %s3498_s29 = smov 128  }
  0x69   : > { %2504 = dma.hbm_to_vmem [thread:$0]  (!%p3495_p7), %s3450_s6, 512, %s319_s24, [#allocation9], %s3498_s29, %s3498_s29, %s3497_s13  }
  0x6a   : > { %s2877_s5 = smov [#allocation13]   ;;  %p3499_p6 = pmov %p3496_p8 }
  0x6b   : > { %s344_s26 = sshll.u32 %s2877_s5, 4  ;;  %s345_s26 = int_to_ptr.vmem [resolvable:$true] %s344_s26 }
  0x6c   : > { %s2722_s12 = scalar_lea.vmem %s345_s26, 512  ;;  %p2730_p5 = scmp.lt.s32.totalorder %s345_s26, %s345_s26 }
  0x6d   : > { %p2723_p3 = scmp.ne.s32.totalorder %s345_s26, %s2722_s12  ;;  %p2731_p1 = scmp.lt.s32.totalorder %s2722_s12, %s2722_s12 }
  0x6f   : > { %p2725_p9 = pnand %p2723_p3, %p3499_p6  ;;  %p2732_p8 = por %p2731_p1, %p2730_p5 }
  0x71   : > { %p2726_p2 = pneg %p2725_p9 }
  0x73   : > { %p2733_p10 = pnand %p2732_p8, %p2726_p2 }
  0x75   : > { %2736 = shalt.err (!%p2733_p10)
}
  0x76   : > { %2510 = dma.hbm_to_vmem [thread:$0]  (!%p3495_p7), %s3452_s8, 512, %s345_s26, [#allocation12], %s3498_s29, %s3498_s29, %s3497_s13  }
  0x77   : > { %s3500_s0 = sld [smem:[#allocation25_spill]]  ;;  %s365_s23 = scalar_lea.vmem [#allocation2], %s3043_s30 }
  0x78   : > { %s372_s7 = sshll.u32 %s365_s23, 4  ;;  %s3501_s5 = sand.u32 1, %s2865_s15   ;;  %s373_s7 = int_to_ptr.vmem [resolvable:$true] %s372_s7 }
  0x79   : > { %s362_s12 = scalar_lea.sflag [#allocation3], %s3501_s5  ;;  %p3502_p12 = scmp.ne.s32.totalorder %s3494_s16, 0 }
  0x7d   : > { %s3117_s22 = scalar_lea.hbm %s3500_s0, %s3046_s11  ;;  %s2742_s29 = scalar_lea.hbm %s3500_s0, 256 }
  0x7e   : > { %s2737_s1 = scalar_lea.hbm %s3117_s22, 128  ;;  %p2743_p7 = scmp.lt.s32.totalorder %s3117_s22, %s3500_s0 }
  0x7f   : > { %p2738_p11 = scmp.ne.s32.totalorder %s3117_s22, %s2737_s1  ;;  %p2744_p3 = scmp.lt.s32.totalorder %s2742_s29, %s2737_s1 }
  0x81   : > { %p2740_p0 = pnand %p2738_p11, %p3502_p12  ;;  %p2745_p6 = por %p2744_p3, %p2743_p7 }
  0x83   : > { %p2741_p4 = pneg %p2740_p0 }
  0x85   : > { %p2746_p9 = pnand %p2745_p6, %p2741_p4 }
  0x87   : > { %2749 = shalt.err (!%p2746_p9)
}
  0x88   : > { %s2750_s21 = scalar_lea.vmem %s373_s7, 128  ;;  %s2878_s10 = smov [#allocation2]  }
  0x89   : > { %p2751_p2 = scmp.ne.s32.totalorder %s373_s7, %s2750_s21  ;;  %s2755_s23 = sshll.u32 %s2878_s10, 4  ;;  %s2756_s23 = int_to_ptr.vmem [resolvable:$false] %s2755_s23 }
  0x8a   : > { %s2757_s5 = scalar_lea.vmem %s2756_s23, 256  ;;  %p2758_p8 = scmp.lt.s32.totalorder %s373_s7, %s2756_s23 }
  0x8b   : > { %p2753_p5 = pnand %p2751_p2, %p3502_p12  ;;  %p2759_p10 = scmp.lt.s32.totalorder %s2757_s5, %s2750_s21 }
  0x8d   : > { %p2754_p1 = pneg %p2753_p5  ;;  %p2760_p11 = por %p2759_p10, %p2758_p8 }
  0x8f   : > { %p2761_p0 = pnand %p2760_p11, %p2754_p1 }
  0x91   : > { %2764 = shalt.err (!%p2761_p0)
}
  0x92   : > { %2514 = dma.hbm_to_vmem [thread:$0]  (!%p3048_p13), %s3117_s22, 128, %s373_s7, %s362_s12  }
  0x93   : > { %s406_s13 = scalar_lea.hbm %s3446_s2, %s3046_s11  ;;  %s401_s29 = scalar_lea.vmem [#allocation7], %s3043_s30 }
  0x94   : > { %s408_s26 = sshll.u32 %s401_s29, 4  ;;  %s2765_s25 = scalar_lea.hbm %s406_s13, 128  ;;  %s409_s26 = int_to_ptr.vmem [resolvable:$true] %s408_s26 }
  0x95   : > { %p2766_p4 = scmp.ne.s32.totalorder %s406_s13, %s2765_s25  ;;  %s2770_s23 = scalar_lea.hbm %s3446_s2, 256 }
  0x96   : > { %p2771_p6 = scmp.lt.s32.totalorder %s406_s13, %s3446_s2  ;;  %p2772_p9 = scmp.lt.s32.totalorder %s2770_s23, %s2765_s25 }
  0x97   : > { %p2768_p7 = pnand %p2766_p4, %p3502_p12 }
  0x98   : > { %p2773_p2 = por %p2772_p9, %p2771_p6 }
  0x99   : > { %p2769_p3 = pneg %p2768_p7 }
  0x9b   : > { %p2774_p5 = pnand %p2773_p2, %p2769_p3 }
  0x9d   : > { %2777 = shalt.err (!%p2774_p5)
}
  0x9e   : > { %s2778_s30 = scalar_lea.vmem %s409_s26, 128  ;;  %s2879_s11 = smov [#allocation7]  }
  0x9f   : > { %p2779_p1 = scmp.ne.s32.totalorder %s409_s26, %s2778_s30  ;;  %s2783_s22 = sshll.u32 %s2879_s11, 4  ;;  %s2784_s22 = int_to_ptr.vmem [resolvable:$false] %s2783_s22 }
  0xa0   : > { %s2785_s7 = scalar_lea.vmem %s2784_s22, 256  ;;  %p2786_p11 = scmp.lt.s32.totalorder %s409_s26, %s2784_s22 }
  0xa1   : > { %p2781_p8 = pnand %p2779_p1, %p3502_p12  ;;  %p2787_p0 = scmp.lt.s32.totalorder %s2785_s7, %s2778_s30 }
  0xa3   : > { %p2782_p10 = pneg %p2781_p8  ;;  %p2788_p4 = por %p2787_p0, %p2786_p11 }
  0xa5   : > { %p2789_p7 = pnand %p2788_p4, %p2782_p10 }
  0xa7   : > { %2792 = shalt.err (!%p2789_p7)
}
  0xa8   : > { %2520 = dma.hbm_to_vmem [thread:$0]  (!%p3048_p13), %s406_s13, 128, %s409_s26, %s3062_s17  }
  0xa9   : > { %p3503_p3 = scmp.ne.s32.totalorder %s3482_s20, 0 }
  0xaa   : > { %s3159_s0 = sand.u32 (!%p3503_p3), 1, %s2861_s14   ;;  %p3504_p12 = scmp.ne.s32.totalorder (!%p3503_p3), %s3488_s27, 0 }
  0xab   : > { %417 = sbr.rel (%p3503_p3) target bundleno = 1810 (0x712), region = 60  ;;  %s3162_s16 = sshll.u32 (!%p3503_p3), %s3159_s0, 3 }
  0xac   : > { %s420_s12 = scalar_lea.sflag (!%p3503_p3), [#allocation3], %s3159_s0  ;;  %s423_s1 = scalar_lea.vmem (!%p3503_p3), [#allocation2], %s3162_s16 }
  0xb0   : > { %2836 = dma.done.wait (%p3504_p12), %s420_s12, 128  }
  0xb1   : > { %2838 = vsyncadd (%p3504_p12), %s420_s12, 4294967168  ;;  %s428_s20 = sand.u32 1, %s2967_s19   ;;  %s432_s18 = scalar_lea.vmem [#allocation5], %s3162_s16 }
  0xb2   : > { %s429_s17 = scalar_lea.sflag [#allocation6], %s428_s20 }
  0xb3   : > { %2840 = dma.done.wait (%p3504_p12), %s429_s17, 256  }
  0xb4   : > { %2842 = vsyncadd (%p3504_p12), %s429_s17, 4294967040  ;;  %s441_s24 = scalar_lea.vmem [#allocation7], %s3162_s16  ;;  %p3505_p13 = scmp.eq.s32.totalorder %s2967_s19, 0 }
  0xb6   : > { %2844 = dma.done.wait (%p3505_p13), [#allocation9], 1024   ;;  %p3506_p6 = pmov %p3505_p13 }
  0xb8   : > { %2846 = vsyncadd (%p3506_p6), [#allocation9], 4294966272  ;;  %p3507_p9 = pmov %p3506_p6 }
  0xb9   : > { %p3508_p2 = pmov %p3506_p6 }
  0xba   : > { %2848 = dma.done.wait (%p3507_p9), [#allocation12], 1024  }
  0xbb   : > { %2850 = vsyncadd (%p3508_p2), [#allocation12], 4294966272  ;;  %vm509_vm0 = vcmask 261120   ;;  %v3185_v0 = vld [vmem:[%s432_s18] sm:$0xff]  ;;  %v3187_v1 = vld [vmem:[%s423_s1] sm:$0xff]  ;;  %v2880_v10 = vmov 0.0   ;;  %v527_v31 = vlaneseq }
  0xbc   : > { %v541_v2 = vsel %vm509_vm0, %v3185_v0, 0.0  ;;  %v510_v3 = vsel %vm509_vm0, %v3187_v1, 0.0  ;;  %v545_v4 = vmul.f32 %v3185_v0, %v3185_v0  ;;  %v515_v5 = vmul.f32 %v3187_v1, %v3187_v1  ;;  %v591_v8 = vld [vmem:[#allocation8 + $0x18] sm:$0xff]  ;;  %2390 = vmatprep.subr.mxu0 %v2880_v10  ;;  %2401 = vmatprep.subr.mxu1 %v2880_v10  ;;  %v590_v11 = vld [vmem:[#allocation8 + $0x10] sm:$0xff]  ;;  %v589_v13 = vld [vmem:[#allocation8 + $0x8] sm:$0xff]  ;;  %s2882_s25 = smov 112  }
  0xbd   : > { %542 = vadd.xlane.f32.xlu0 %v541_v2  ;;  %511 = vadd.xlane.f32.xlu1 %v510_v3  ;;  %v668_v9 = vld [vmem:[#allocation10 + $0x18] sm:$0xff]  ;;  %v667_v12 = vld [vmem:[#allocation10 + $0x10] sm:$0xff]  ;;  %v666_v14 = vld [vmem:[#allocation10 + $0x8] sm:$0xff]  ;;  %vm2881_vm1 = vmmov 0   ;;  %v3213_v32 = vshrl.u32 %v527_v31, 7  ;;  %s2883_s21 = smov 120  }
  0xbe   : > { %v546_v6 = vsel %vm509_vm0, %v545_v4, 0.0  ;;  %v516_v7 = vsel %vm509_vm0, %v515_v5, 0.0  ;;  %2391 = vmatpush3.msra.mxu0 %v591_v8  ;;  %2402 = vmatpush3.msra.mxu1 %v668_v9  ;;  %v588_v15 = vld [vmem:[#allocation8] sm:$0xff]  ;;  %v504_v33 = vld [vmem:[%s3447_s3] sm:$0x1]  ;;  %s2884_s10 = smov 104  }
  0xbf   : > { %2392 = vmatprep.subr.mxu0 %v2880_v10  ;;  %2403 = vmatprep.subr.mxu1 %v2880_v10  ;;  %v665_v16 = vld [vmem:[#allocation10] sm:$0xff]  ;;  %v505_v34 = vld [vmem:[%s3448_s4] sm:$0x1]  ;;  %v529_v35 = vsub.s32 0, %v3213_v32  ;;  %v507_v36 = vmul.f32 0.35355338, %v504_v33 }
  0xc0   : > { %2393 = vmatpush3.msra.mxu0 %v590_v11  ;;  %2404 = vmatpush3.msra.mxu1 %v667_v12  ;;  %v508_v37 = vmul.f32 0.35355338, %v505_v34  ;;  %v3249_v56 = vld [vmem:[%s441_s24] sm:$0xff]  ;;  %v743_v62 = vld [vmem:[#allocation11 + $0x8] sm:$0xff]  ;;  %v742_v63 = vld [vmem:[#allocation11] sm:$0xff]  ;;  %vm1257_vm2 = vcmask 64512  }
  0xc1   : > { %547 = vadd.xlane.f32.xlu0 %v546_v6  ;;  %517 = vadd.xlane.f32.xlu1 %v516_v7  ;;  %v3223_v39 = vrot.slane %v504_v33, %v529_v35  ;;  %v530_v42 = vrot.slane %v507_v36, %v529_v35  ;;  %v3226_v45 = vrot.slane %v505_v34, %v529_v35  ;;  %v571_v57 = vsel %vm509_vm0, %v3249_v56, 0.0  ;;  %v745_v60 = vld [vmem:[#allocation11 + $0x18] sm:$0xff]  ;;  %v744_v61 = vld [vmem:[#allocation11 + $0x10] sm:$0xff]  ;;  %s2887_s23 = smov 16   ;;  %s2888_s5 = smov 8  }
  0xc2   : > { %2394 = vmatprep.subr.mxu0 %v2880_v10  ;;  %2405 = vmatprep.subr.mxu1 %v2880_v10  ;;  %v537_v47 = vrot.slane %v508_v37, %v529_v35  ;;  %v575_v58 = vmul.f32 %v3249_v56, %v3249_v56  ;;  %v2886_v3 = vmov 1934713408   ;;  %s2889_s30 = smov 24   ;;  %vm2047_vm3 = vcmask 130048   ;;  %s2351_s7 = sshll.u32 %s2967_s19, 7 }
  0xc3   : > { %2395 = vmatpush3.msra.mxu0 %v589_v13  ;;  %2406 = vmatpush3.msra.mxu1 %v666_v14  ;;  %v864_v4 = vunpack.c.l.s4 %v2886_v3  ;;  %vm2049_vm4 = vcmask 195584   ;;  %s503_s12 = scalar_lea.vmem [#allocation14], %s3162_s16  ;;  %s3509_s18 = sld [smem:[#allocation29_spill]] }
  0xc4   : > { %2396 = vmatprep.subr.mxu0 %v2880_v10  ;;  %2407 = vmatprep.subr.mxu1 %v2880_v10  ;;  %v576_v59 = vsel %vm509_vm0, %v575_v58, 0.0  ;;  %s2152_s1 = sshll.u32 %s503_s12, 4  ;;  %s2139_s27 = scalar_lea.sflag [#allocation4], %s3159_s0  ;;  %s2153_s1 = int_to_ptr.vmem [resolvable:$true] %s2152_s1 }
  0xc5   : > { %2397 = vmatpush3.msra.mxu0 %v588_v15  ;;  %2398 = vmatprep.mubr.msk.f32.mxu0 %vm2881_vm1, %v2880_v10  ;;  %v865_v7 = vunpack.c.0.s8 %v864_v4  ;;  %s2793_s13 = scalar_lea.vmem %s2153_s1, 128  ;;  %p3510_p1 = scmp.ne.s32.totalorder %s3489_s28, 0 }
  0xc6   : > { %2408 = vmatpush3.msra.mxu1 %v665_v16  ;;  %2409 = vmatprep.mubr.msk.f32.mxu1 %vm2881_vm1, %v2880_v10  ;;  %p2794_p5 = scmp.ne.s32.totalorder %s2153_s1, %s2793_s13  ;;  %s2890_s19 = smov [#allocation14]  }
  0xc7   : > { %2423 = vmatprep.subr.mxu1 %v2880_v10  ;;  %2412 = vmatprep.subr.mxu0 %v2880_v10  ;;  %v3264_v16 = vsub.s32 %v865_v7, %v3213_v32  ;;  %s2797_s16 = sshll.u32 %s2890_s19, 4  ;;  %s2798_s16 = int_to_ptr.vmem [resolvable:$false] %s2797_s16 }
  0xc8   : > { %p2795_p8 = pnand %p2794_p5, %p3510_p1  ;;  %s2799_s29 = scalar_lea.vmem %s2798_s16, 256 }
  0xc9   : > { %s2150_s24 = scalar_lea.hbm %s3509_s18, %s2351_s7  ;;  %p2800_p11 = scmp.lt.s32.totalorder %s2153_s1, %s2798_s16 }
  0xca   : > { %p2796_p10 = pneg %p2795_p8  ;;  %p2801_p0 = scmp.lt.s32.totalorder %s2799_s29, %s2793_s13 }
  0xcc   : > { %p2802_p4 = por %p2801_p0, %p2800_p11 }
  0xce   : > { %p2803_p7 = pnand %p2802_p4, %p2796_p10 }
 0x146   : > { %v543_v17 = vpop.xlane.xlu0 %542  ;;  %v512_v18 = vpop.xlane.xlu1 %511 }
 0x147   : > { %v544_v19 = vmul.f32 0.03125, %v543_v17  ;;  %v514_v20 = vmul.f32 0.03125, %v512_v18 }
 0x149   : > { %v520_v21 = vmul.f32 %v514_v20, %v514_v20  ;;  %v550_v24 = vmul.f32 %v544_v19, %v544_v19  ;;  %v554_v38 = vsub.f32 %v3185_v0, %v544_v19  ;;  %v524_v41 = vsub.f32 %v3187_v1, %v514_v20 }
 0x14a   : > { %v548_v22 = vpop.xlane.xlu0 %547  ;;  %v518_v23 = vpop.xlane.xlu1 %517  ;;  %v2885_v0 = vmov 1983009808  }
 0x14b   : > { %v549_v25 = vmul.f32 0.03125, %v548_v22  ;;  %v519_v26 = vmul.f32 0.03125, %v518_v23  ;;  %v832_v2 = vunpack.c.l.s4 %v2885_v0 }
 0x14d   : > { %v551_v27 = vsub.f32 %v549_v25, %v550_v24  ;;  %v521_v28 = vsub.f32 %v519_v26, %v520_v21  ;;  %v833_v5 = vunpack.c.0.s8 %v832_v2 }
 0x14f   : > { %v552_v29 = vadd.f32 1e-05, %v551_v27  ;;  %v522_v30 = vadd.f32 1e-05, %v521_v28  ;;  %v3261_v8 = vsub.s32 %v833_v5, %v3213_v32 }
 0x151   : > { %2583 = vrsqrt.f32 %v552_v29 }
 0x152   : > { %2585 = vrsqrt.f32 %v522_v30 }
 0x15e   : > { %v2584_v40 = vpop.eup %2583 }
 0x15f   : > { %v2586_v43 = vpop.eup %2585  ;;  %v555_v44 = vmul.f32 %v2584_v40, %v554_v38 }
 0x160   : > { %v525_v46 = vmul.f32 %v2586_v43, %v524_v41 }
 0x161   : > { %v562_v48 = vmul.f32 %v3223_v39, %v555_v44 }
 0x162   : > { %v532_v49 = vmul.f32 %v530_v42, %v525_v46 }
 0x163   : > { %v569_v50 = vadd.f32 %v3226_v45, %v562_v48 }
 0x164   : > { %v539_v51 = vadd.f32 %v537_v47, %v532_v49 }
 0x165   : > { %2410 = vmatmul.mubr.msk.f32.vlgmr.msra.gmra.mxu1 %vm509_vm0, %v569_v50 }
 0x166   : > { %2399 = vmatmul.mubr.msk.f32.vlgmr.msra.gmra.mxu0 %vm509_vm0, %v539_v51  ;;  %2425 = vmatprep.mubr.msk.f32.mxu1 %vm2881_vm1, %v2880_v10 }
 0x167   : > { %2420 = vmatprep.mubr.msk.f32.mxu0 %vm2881_vm1, %v2880_v10  ;;  %2413 = vmatpush3.msra.mxu0 %v745_v60 }
 0x168   : > { %2414 = vmatprep.subr.mxu0 %v2880_v10 }
 0x169   : > { %2415 = vmatpush3.msra.mxu0 %v744_v61 }
 0x16a   : > { %2416 = vmatprep.subr.mxu0 %v2880_v10 }
 0x16b   : > { %2417 = vmatpush3.msra.mxu0 %v743_v62 }
 0x16c   : > { %2418 = vmatprep.subr.mxu0 %v2880_v10 }
 0x16d   : > { %2419 = vmatpush3.msra.mxu0 %v742_v63 }
 0x16e   : > { %2443 = vmatprep.subr.mxu0 %v2880_v10 }
 0x225   : > { %v738_v52 = vpop.f32.mrf.mxu1 }
 0x226   : > { %v3236_v53 = vpop.f32.mrf.mxu0  ;;  %969 = vrot.lane.b32.xlu1 %v738_v52, %s2882_s25  ;;  %966 = vrot.lane.b32.xlu0 %v738_v52, %s2883_s21 }
 0x227   : > { %v2411_v54 = vpop.f32.mrf.mxu1 }
 0x228   : > { %v2400_v55 = vpop.f32.mrf.mxu0 }
 0x22a   : > { %972 = vrot.lane.b32.xlu1 %v738_v52, %s2884_s10  ;;  %823 = vrot.lane.b32.xlu0 %v3236_v53, %s2882_s25 }
 0x22e   : > { %820 = vrot.lane.b32.xlu1 %v3236_v53, %s2883_s21 }
 0x232   : > { %826 = vrot.lane.b32.xlu1 %v3236_v53, %s2884_s10 }
 0x249   : > { %572 = vadd.xlane.f32.xlu0 %v571_v57 }
 0x256   : > { %577 = vadd.xlane.f32.xlu1 %v576_v59 }
 0x298   : > { %v970_v6 = vpop.permute.xlu1 %969  ;;  %v967_v12 = vpop.permute.xlu0 %966 }
 0x299   : > { %v975_v9 = vcombine.low %v738_v52, %v970_v6  ;;  %v976_v11 = vcombine.high %v738_v52, %v970_v6 }
 0x29b   : > { %v983_v17 = vrot.slane %v975_v9, %v3261_v8  ;;  %v990_v18 = vrot.slane %v976_v11, %v3261_v8 }
 0x29c   : > { %v973_v13 = vpop.permute.xlu1 %972  ;;  %v824_v26 = vpop.permute.xlu0 %823 }
 0x29d   : > { %v991_v14 = vcombine.low %v967_v12, %v973_v13  ;;  %v992_v15 = vcombine.high %v967_v12, %v973_v13  ;;  %v829_v31 = vcombine.low %v3236_v53, %v824_v26  ;;  %v830_v32 = vcombine.high %v3236_v53, %v824_v26 }
 0x29f   : > { %v999_v19 = vrot.slane %v991_v14, %v3261_v8  ;;  %v1006_v20 = vrot.slane %v992_v15, %v3261_v8  ;;  %v837_v46 = vrot.slane %v829_v31, %v3261_v8  ;;  %v844_v47 = vrot.slane %v830_v32, %v3261_v8 }
 0x2a0   : > { %v821_v21 = vpop.permute.xlu1 %820 }
 0x2a1   : > { %v1007_v22 = vcombine.low %v983_v17, %v999_v19  ;;  %v1008_v23 = vcombine.high %v983_v17, %v999_v19  ;;  %v1023_v24 = vcombine.low %v990_v18, %v1006_v20  ;;  %v1024_v25 = vcombine.high %v990_v18, %v1006_v20 }
 0x2a3   : > { %v1015_v27 = vrot.slane %v1007_v22, %v3264_v16  ;;  %v1022_v28 = vrot.slane %v1008_v23, %v3264_v16  ;;  %v1031_v29 = vrot.slane %v1023_v24, %v3264_v16  ;;  %v1038_v30 = vrot.slane %v1024_v25, %v3264_v16 }
 0x2a4   : > { %v827_v33 = vpop.permute.xlu1 %826 }
 0x2a5   : > { %v1043_v34 = vcombine.low %v1015_v27, %v1022_v28  ;;  %v2330_v35 = vcombine.high %v1015_v27, %v1022_v28  ;;  %v1059_v36 = vcombine.low %v1031_v29, %v1038_v30  ;;  %v2331_v37 = vcombine.high %v1031_v29, %v1038_v30 }
 0x2a6   : > { %v845_v38 = vcombine.low %v821_v21, %v827_v33  ;;  %v846_v40 = vcombine.high %v821_v21, %v827_v33 }
 0x2a7   : > { %v1050_v41 = vrot.slane %v1043_v34, %v3261_v8  ;;  %v1058_v42 = vrot.slane %v2330_v35, %v3261_v8  ;;  %v1066_v43 = vrot.slane %v1059_v36, %v3261_v8  ;;  %v1074_v44 = vrot.slane %v2331_v37, %v3261_v8 }
 0x2a8   : > { %v853_v48 = vrot.slane %v845_v38, %v3261_v8  ;;  %v860_v49 = vrot.slane %v846_v40, %v3261_v8 }
 0x2a9   : > { %v1075_v50 = vcombine.low %v1050_v41, %v1058_v42  ;;  %v1091_v51 = vcombine.low %v1066_v43, %v1074_v44  ;;  %v1076_v13 = vcombine.high %v1050_v41, %v1058_v42  ;;  %v1092_v14 = vcombine.high %v1066_v43, %v1074_v44 }
 0x2aa   : > { %v861_v52 = vcombine.low %v837_v46, %v853_v48  ;;  %v862_v53 = vcombine.high %v837_v46, %v853_v48  ;;  %v877_v54 = vcombine.low %v844_v47, %v860_v49  ;;  %v878_v55 = vcombine.high %v844_v47, %v860_v49 }
 0x2ab   : > { %v1083_v57 = vrot.slane %v1075_v50, %v3264_v16  ;;  %v1099_v58 = vrot.slane %v1091_v51, %v3264_v16  ;;  %v1090_v22 = vrot.slane %v1076_v13, %v3264_v16  ;;  %v1106_v23 = vrot.slane %v1092_v14, %v3264_v16 }
 0x2ac   : > { %v869_v59 = vrot.slane %v861_v52, %v3264_v16  ;;  %v876_v60 = vrot.slane %v862_v53, %v3264_v16  ;;  %v885_v61 = vrot.slane %v877_v54, %v3264_v16  ;;  %v892_v62 = vrot.slane %v878_v55, %v3264_v16 }
 0x2ad   : > { %v1107_v63 = vcombine.low %v1083_v57, %v1099_v58  ;;  %v1108_v21 = vcombine.high %v1083_v57, %v1099_v58  ;;  %v1109_v27 = vcombine.low %v1090_v22, %v1106_v23  ;;  %v1110_v29 = vcombine.high %v1090_v22, %v1106_v23 }
 0x2ae   : > { %v897_v0 = vcombine.low %v869_v59, %v876_v60  ;;  %v2328_v2 = vcombine.high %v869_v59, %v876_v60  ;;  %v913_v3 = vcombine.low %v885_v61, %v892_v62  ;;  %v2329_v4 = vcombine.high %v885_v61, %v892_v62 }
 0x2af   : > { %2424 = vmatpush3.xpose.msk.msra.mxu1 %vm1257_vm2, %v1107_v63 }
 0x2b0   : > { %v904_v5 = vrot.slane %v897_v0, %v3261_v8  ;;  %v912_v6 = vrot.slane %v2328_v2, %v3261_v8  ;;  %v920_v7 = vrot.slane %v913_v3, %v3261_v8  ;;  %v928_v9 = vrot.slane %v2329_v4, %v3261_v8  ;;  %2428 = vmatprep.subr.mxu1 %v2880_v10 }
 0x2b2   : > { %v929_v11 = vcombine.low %v904_v5, %v912_v6  ;;  %v945_v12 = vcombine.low %v920_v7, %v928_v9  ;;  %v930_v18 = vcombine.high %v904_v5, %v912_v6  ;;  %v946_v19 = vcombine.high %v920_v7, %v928_v9 }
 0x2b4   : > { %v937_v15 = vrot.slane %v929_v11, %v3264_v16  ;;  %v953_v17 = vrot.slane %v945_v12, %v3264_v16  ;;  %v944_v25 = vrot.slane %v930_v18, %v3264_v16  ;;  %v960_v26 = vrot.slane %v946_v19, %v3264_v16 }
 0x2b6   : > { %v961_v20 = vcombine.low %v937_v15, %v953_v17  ;;  %v962_v24 = vcombine.high %v937_v15, %v953_v17  ;;  %v963_v28 = vcombine.low %v944_v25, %v960_v26  ;;  %v964_v30 = vcombine.high %v944_v25, %v960_v26 }
 0x2b8   : > { %2426 = vmatmul.mubr.msk.f32.vlgmr.msra.gmra.mxu1 %vm1257_vm2, %v961_v20 }
 0x2b9   : > { %2429 = vmatpush3.xpose.msk.msra.mxu1 %vm1257_vm2, %v1108_v21  ;;  %2430 = vmatprep.mubr.msk.f32.mxu1 %vm2881_vm1, %v2880_v10 }
 0x2ba   : > { %2433 = vmatprep.subr.mxu1 %v2880_v10 }
 0x2bc   : > { %2431 = vmatmul.mubr.msk.f32.vlgmr.msra.gmra.mxu1 %vm1257_vm2, %v962_v24 }
 0x2bd   : > { %2434 = vmatpush3.xpose.msk.msra.mxu1 %vm1257_vm2, %v1109_v27  ;;  %2435 = vmatprep.mubr.msk.f32.mxu1 %vm2881_vm1, %v2880_v10 }
 0x2be   : > { %2438 = vmatprep.subr.mxu1 %v2880_v10 }
 0x2c0   : > { %2436 = vmatmul.mubr.msk.f32.vlgmr.msra.gmra.mxu1 %vm1257_vm2, %v963_v28 }
 0x2c1   : > { %2439 = vmatpush3.xpose.msk.msra.mxu1 %vm1257_vm2, %v1110_v29  ;;  %2440 = vmatprep.mubr.msk.f32.mxu1 %vm2881_vm1, %v2880_v10 }
 0x2c2   : > { %2448 = vmatprep.subr.mxu1 %v2880_v10 }
 0x2c4   : > { %2441 = vmatmul.mubr.msk.f32.vlgmr.msra.gmra.mxu1 %vm1257_vm2, %v964_v30 }
 0x2c5   : > { %2450 = vmatprep.mubr.msk.f32.mxu1 %vm2881_vm1, %v2880_v10 }
 0x2d2   : > { %v573_v31 = vpop.xlane.xlu0 %572 }
 0x2d3   : > { %v574_v32 = vmul.f32 0.03125, %v573_v31 }
 0x2d5   : > { %v580_v33 = vmul.f32 %v574_v32, %v574_v32  ;;  %v584_v38 = vsub.f32 %v3249_v56, %v574_v32 }
 0x2df   : > { %v578_v34 = vpop.xlane.xlu1 %577 }
 0x2e0   : > { %v579_v35 = vmul.f32 0.03125, %v578_v34 }
 0x2e2   : > { %v581_v36 = vsub.f32 %v579_v35, %v580_v33 }
 0x2e4   : > { %v582_v37 = vadd.f32 1e-05, %v581_v36 }
 0x2e6   : > { %2587 = vrsqrt.f32 %v582_v37 }
 0x2f3   : > { %v2588_v40 = vpop.eup %2587 }
 0x2f4   : > { %v585_v41 = vmul.f32 %v2588_v40, %v584_v38 }
 0x2f6   : > { %v586_v42 = vmul.f32 %v585_v41, %v3223_v39 }
 0x2f8   : > { %v587_v43 = vadd.f32 %v586_v42, %v3226_v45 }
 0x2fa   : > { %2421 = vmatmul.mubr.msk.f32.vlgmr.msra.gmra.mxu0 %vm509_vm0, %v587_v43 }
 0x2fb   : > { %2445 = vmatprep.mubr.msk.f32.mxu0 %vm2881_vm1, %v2880_v10 }
 0x378   : > { %v1330_v44 = vpop.f32.mrf.mxu1 }
 0x379   : > { %v1562_v46 = vsel %vm1257_vm2, %v1330_v44, -inf }
 0x37a   : > { %1563 = vmax.xlane.f32.xlu0 %v1562_v46  ;;  %v2427_v47 = vpop.f32.mrf.mxu1 }
 0x37c   : > { %v1406_v48 = vpop.f32.mrf.mxu1 }
 0x37d   : > { %v1565_v49 = vsel %vm1257_vm2, %v1406_v48, -inf }
 0x37e   : > { %1566 = vmax.xlane.f32.xlu0 %v1565_v49  ;;  %v2432_v56 = vpop.f32.mrf.mxu1 }
 0x380   : > { %v1482_v50 = vpop.f32.mrf.mxu1 }
 0x381   : > { %v1568_v39 = vsel %vm1257_vm2, %v1482_v50, -inf }
 0x382   : > { %1569 = vmax.xlane.f32.xlu0 %v1568_v39  ;;  %v2437_v45 = vpop.f32.mrf.mxu1 }
 0x384   : > { %v1558_v51 = vpop.f32.mrf.mxu1 }
 0x385   : > { %v1571_v52 = vsel %vm1257_vm2, %v1558_v51, -inf }
 0x386   : > { %1572 = vmax.xlane.f32.xlu1 %v1571_v52  ;;  %v2442_v53 = vpop.f32.mrf.mxu1 }
 0x3ba   : > { %v815_v54 = vpop.f32.mrf.mxu0 }
 0x3bc   : > { %v2422_v55 = vpop.f32.mrf.mxu0 }
 0x403   : > { %v1564_v57 = vpop.xlane.xlu0 %1563 }
 0x404   : > { %v1574_v58 = vsub.f32 %v1330_v44, %v1564_v57 }
 0x406   : > { %v1578_v59 = vmul.f32 1.442695, %v1574_v58 }
 0x407   : > { %v1567_v60 = vpop.xlane.xlu0 %1566 }
 0x408   : > { %2589 = vpow2.f32 %v1578_v59  ;;  %v1575_v61 = vsub.f32 %v1406_v48, %v1567_v60 }
 0x40a   : > { %v1580_v62 = vmul.f32 1.442695, %v1575_v61 }
 0x40b   : > { %v1570_v63 = vpop.xlane.xlu0 %1569 }
 0x40c   : > { %2591 = vpow2.f32 %v1580_v62  ;;  %v1576_v0 = vsub.f32 %v1482_v50, %v1570_v63 }
 0x40e   : > { %v1582_v2 = vmul.f32 1.442695, %v1576_v0 }
 0x40f   : > { %v1573_v11 = vpop.xlane.xlu1 %1572 }
 0x410   : > { %2593 = vpow2.f32 %v1582_v2  ;;  %v1577_v12 = vsub.f32 %v1558_v51, %v1573_v11 }
 0x412   : > { %v1584_v13 = vmul.f32 1.442695, %v1577_v12 }
 0x414   : > { %2595 = vpow2.f32 %v1584_v13 }
 0x415   : > { %v3330_v3 = vpop.eup %2589 }
 0x416   : > { %v1586_v4 = vsel %vm1257_vm2, %v3330_v3, 0.0 }
 0x417   : > { %1587 = vadd.xlane.f32.xlu0 %v1586_v4 }
 0x419   : > { %v3334_v5 = vpop.eup %2591 }
 0x41a   : > { %v1589_v6 = vsel %vm1257_vm2, %v3334_v5, 0.0 }
 0x41b   : > { %1590 = vadd.xlane.f32.xlu1 %v1589_v6 }
 0x41d   : > { %v3338_v7 = vpop.eup %2593 }
 0x41e   : > { %v1592_v9 = vsel %vm1257_vm2, %v3338_v7, 0.0 }
 0x41f   : > { %1593 = vadd.xlane.f32.xlu0 %v1592_v9 }
 0x421   : > { %v3344_v14 = vpop.eup %2595 }
 0x422   : > { %v1595_v15 = vsel %vm1257_vm2, %v3344_v14, 0.0 }
 0x42c   : > { %1115 = vrot.lane.b32.xlu1 %v815_v54, %s2882_s25 }
 0x435   : > { %1112 = vrot.lane.b32.xlu0 %v815_v54, %s2883_s21 }
 0x450   : > { %1596 = vadd.xlane.f32.xlu1 %v1595_v15 }
 0x461   : > { %1118 = vrot.lane.b32.xlu1 %v815_v54, %s2884_s10 }
 0x4a0   : > { %v1588_v18 = vpop.xlane.xlu0 %1587 }
 0x4a1   : > { %2597 = vrcp.f32 %v1588_v18 }
 0x4a4   : > { %v1591_v17 = vpop.xlane.xlu1 %1590 }
 0x4a5   : > { %2599 = vrcp.f32 %v1591_v17 }
 0x4a8   : > { %v1116_v19 = vpop.permute.xlu1 %1115  ;;  %v1594_v20 = vpop.xlane.xlu0 %1593 }
 0x4a9   : > { %v1121_v22 = vcombine.low %v815_v54, %v1116_v19  ;;  %v1122_v23 = vcombine.high %v815_v54, %v1116_v19  ;;  %2601 = vrcp.f32 %v1594_v20 }
 0x4ab   : > { %v1129_v28 = vrot.slane %v1121_v22, %v3261_v8  ;;  %v1136_v29 = vrot.slane %v1122_v23, %v3261_v8 }
 0x4ac   : > { %v1113_v24 = vpop.permute.xlu0 %1112 }
 0x4ae   : > { %v2598_v51 = vpop.eup %2597 }
 0x4af   : > { %v1602_v61 = vmul.f32 %v2598_v51, %v3330_v3 }
 0x4b2   : > { %v2600_v52 = vpop.eup %2599 }
 0x4b3   : > { %v1603_v62 = vmul.f32 %v2600_v52, %v3334_v5  ;;  %v2054_v5 = vld [vmem:[#allocation13 + $0x18] sm:$0xff] }
 0x4b6   : > { %v2602_v58 = vpop.eup %2601 }
 0x4b7   : > { %v1604_v4 = vmul.f32 %v2602_v58, %v3338_v7 }
 0x4d9   : > { %v1597_v21 = vpop.xlane.xlu1 %1596 }
 0x4da   : > { %2603 = vrcp.f32 %v1597_v21 }
 0x4dd   : > { %v1119_v25 = vpop.permute.xlu1 %1118 }
 0x4de   : > { %v1137_v26 = vcombine.low %v1113_v24, %v1119_v25  ;;  %v1138_v27 = vcombine.high %v1113_v24, %v1119_v25 }
 0x4e0   : > { %v1145_v30 = vrot.slane %v1137_v26, %v3261_v8  ;;  %v1152_v31 = vrot.slane %v1138_v27, %v3261_v8 }
 0x4e2   : > { %v1153_v32 = vcombine.low %v1129_v28, %v1145_v30  ;;  %v1154_v33 = vcombine.high %v1129_v28, %v1145_v30  ;;  %v1169_v34 = vcombine.low %v1136_v29, %v1152_v31  ;;  %v1170_v35 = vcombine.high %v1136_v29, %v1152_v31  ;;  %v2053_v29 = vld [vmem:[#allocation13 + $0x10] sm:$0xff]  ;;  %v2052_v30 = vld [vmem:[#allocation13 + $0x8] sm:$0xff] }
 0x4e4   : > { %v1161_v36 = vrot.slane %v1153_v32, %v3264_v16  ;;  %v1168_v37 = vrot.slane %v1154_v33, %v3264_v16  ;;  %v1177_v38 = vrot.slane %v1169_v34, %v3264_v16  ;;  %v1184_v40 = vrot.slane %v1170_v35, %v3264_v16 }
 0x4e6   : > { %v1189_v41 = vcombine.low %v1161_v36, %v1168_v37  ;;  %v2332_v42 = vcombine.high %v1161_v36, %v1168_v37  ;;  %v1205_v43 = vcombine.low %v1177_v38, %v1184_v40  ;;  %v2333_v44 = vcombine.high %v1177_v38, %v1184_v40  ;;  %v2051_v40 = vld [vmem:[#allocation13] sm:$0xff] }
 0x4e7   : > { %v2604_v63 = vpop.eup %2603 }
 0x4e8   : > { %v1196_v46 = vrot.slane %v1189_v41, %v3261_v8  ;;  %v1204_v47 = vrot.slane %v2332_v42, %v3261_v8  ;;  %v1212_v48 = vrot.slane %v1205_v43, %v3261_v8  ;;  %v1220_v49 = vrot.slane %v2333_v44, %v3261_v8 }
 0x4e9   : > { %v1605_v3 = vmul.f32 %v2604_v63, %v3344_v14 }
 0x4ea   : > { %v1221_v56 = vcombine.low %v1196_v46, %v1204_v47  ;;  %v1237_v50 = vcombine.low %v1212_v48, %v1220_v49  ;;  %v1222_v39 = vcombine.high %v1196_v46, %v1204_v47  ;;  %v1238_v45 = vcombine.high %v1212_v48, %v1220_v49 }
 0x4ec   : > { %v1229_v53 = vrot.slane %v1221_v56, %v3264_v16  ;;  %v1245_v54 = vrot.slane %v1237_v50, %v3264_v16  ;;  %v1236_v55 = vrot.slane %v1222_v39, %v3264_v16  ;;  %v1252_v57 = vrot.slane %v1238_v45, %v3264_v16 }
 0x4ee   : > { %v1253_v59 = vcombine.low %v1229_v53, %v1245_v54  ;;  %v1254_v60 = vcombine.high %v1229_v53, %v1245_v54  ;;  %v1255_v0 = vcombine.low %v1236_v55, %v1252_v57  ;;  %v1256_v2 = vcombine.high %v1236_v55, %v1252_v57 }
 0x4f0   : > { %2444 = vmatpush3.msra.mxu0 %v1253_v59  ;;  %2449 = vmatpush3.msra.mxu1 %v1254_v60  ;;  %v2348_v59 = vld [vmem:[%s3453_s9] ss:$0 sm:$0xff] }
 0x4f1   : > { %2446 = vmatmul.mubr.msk.f32.vlgmr.msra.gmra.mxu0 %vm1257_vm2, %v1602_v61  ;;  %2451 = vmatmul.mubr.msk.f32.vlgmr.msra.gmra.mxu1 %vm1257_vm2, %v1603_v62 }
 0x4f2   : > { %2453 = vmatprep.subr.mxu0 %v2880_v10  ;;  %2458 = vmatprep.subr.mxu1 %v2880_v10 }
 0x4f3   : > { %2454 = vmatpush3.msra.mxu0 %v1255_v0  ;;  %2459 = vmatpush3.msra.mxu1 %v1256_v2 }
 0x4f4   : > { %2455 = vmatprep.mubr.msk.f32.mxu0 %vm2881_vm1, %v2880_v10  ;;  %2460 = vmatprep.mubr.msk.f32.mxu1 %vm2881_vm1, %v2880_v10 }
 0x4f5   : > { %2456 = vmatmul.mubr.msk.f32.vlgmr.msra.gmra.mxu0 %vm1257_vm2, %v1604_v4  ;;  %2461 = vmatmul.mubr.msk.f32.vlgmr.msra.gmra.mxu1 %vm1257_vm2, %v1605_v3 }
 0x4f6   : > { %2463 = vmatprep.subr.mxu0 %v2880_v10  ;;  %2471 = vmatprep.mubr.msk.f32.mxu0 %vm2881_vm1, %v2880_v10 }
 0x4f7   : > { %2464 = vmatpush3.msra.mxu0 %v2054_v5 }
 0x4f8   : > { %2465 = vmatprep.subr.mxu0 %v2880_v10 }
 0x4f9   : > { %2466 = vmatpush3.msra.mxu0 %v2053_v29 }
 0x4fa   : > { %2467 = vmatprep.subr.mxu0 %v2880_v10 }
 0x4fb   : > { %2468 = vmatpush3.msra.mxu0 %v2052_v30 }
 0x4fc   : > { %2469 = vmatprep.subr.mxu0 %v2880_v10 }
 0x4fd   : > { %2470 = vmatpush3.msra.mxu0 %v2051_v40 }
 0x5b1   : > { %v1675_v6 = vpop.f32.mrf.mxu0  ;;  %v1748_v7 = vpop.f32.mrf.mxu1 }
 0x5b3   : > { %v2447_v9 = vpop.f32.mrf.mxu0  ;;  %v2452_v11 = vpop.f32.mrf.mxu1 }
 0x5b5   : > { %v1821_v12 = vpop.f32.mrf.mxu0  ;;  %v1894_v13 = vpop.f32.mrf.mxu1 }
 0x5b6   : > { %v1898_v14 = vcombine.low %v1675_v6, %v1821_v12  ;;  %v1899_v15 = vcombine.high %v1675_v6, %v1821_v12  ;;  %v1914_v17 = vcombine.low %v1748_v7, %v1894_v13  ;;  %v1915_v18 = vcombine.high %v1748_v7, %v1894_v13 }
 0x5b7   : > { %v2457_v19 = vpop.f32.mrf.mxu0  ;;  %v2462_v20 = vpop.f32.mrf.mxu1 }
 0x5b8   : > { %v1906_v21 = vrot.slane %v1898_v14, %v3261_v8  ;;  %v1913_v22 = vrot.slane %v1899_v15, %v3261_v8  ;;  %v1922_v23 = vrot.slane %v1914_v17, %v3261_v8  ;;  %v1929_v24 = vrot.slane %v1915_v18, %v3261_v8 }
 0x5ba   : > { %v1930_v25 = vcombine.low %v1906_v21, %v1922_v23  ;;  %v1931_v26 = vcombine.high %v1906_v21, %v1922_v23  ;;  %v1946_v27 = vcombine.low %v1913_v22, %v1929_v24  ;;  %v1947_v28 = vcombine.high %v1913_v22, %v1929_v24 }
 0x5bc   : > { %v1938_v31 = vrot.slane %v1930_v25, %v3264_v16  ;;  %v1945_v32 = vrot.slane %v1931_v26, %v3264_v16  ;;  %v1954_v33 = vrot.slane %v1946_v27, %v3264_v16  ;;  %v1961_v34 = vrot.slane %v1947_v28, %v3264_v16 }
 0x5be   : > { %v1966_v35 = vcombine.low %v1938_v31, %v1945_v32  ;;  %v2346_v36 = vcombine.high %v1938_v31, %v1945_v32  ;;  %v1982_v37 = vcombine.low %v1954_v33, %v1961_v34  ;;  %v2347_v38 = vcombine.high %v1954_v33, %v1961_v34 }
 0x5c0   : > { %v1973_v41 = vrot.slane %v1966_v35, %v3261_v8  ;;  %v1981_v42 = vrot.slane %v2346_v36, %v3261_v8  ;;  %v1989_v43 = vrot.slane %v1982_v37, %v3261_v8  ;;  %v1997_v44 = vrot.slane %v2347_v38, %v3261_v8 }
 0x5c2   : > { %v1999_v46 = vcombine.high %v1973_v41, %v1981_v42  ;;  %v2015_v47 = vcombine.high %v1989_v43, %v1997_v44  ;;  %v1998_v48 = vcombine.low %v1973_v41, %v1981_v42  ;;  %v2014_v49 = vcombine.low %v1989_v43, %v1997_v44 }
 0x5c4   : > { %v2013_v56 = vrot.slane %v1999_v46, %v3264_v16  ;;  %v2029_v50 = vrot.slane %v2015_v47, %v3264_v16  ;;  %v2006_v10 = vrot.slane %v1998_v48, %v3264_v16  ;;  %v2022_v39 = vrot.slane %v2014_v49, %v3264_v16 }
 0x5c6   : > { %v2032_v45 = vcombine.low %v2013_v56, %v2029_v50  ;;  %v2031_v51 = vcombine.high %v2006_v10, %v2022_v39  ;;  %v2030_v52 = vcombine.low %v2006_v10, %v2022_v39  ;;  %v2033_v8 = vcombine.high %v2013_v56, %v2029_v50 }
 0x5c8   : > { %2039 = vrot.lane.b32.xlu0 %v2032_v45, %s2887_s23  ;;  %2035 = vrot.lane.b32.xlu1 %v2031_v51, %s2888_s5 }
 0x5cc   : > { %2043 = vrot.lane.b32.xlu1 %v2033_v8, %s2889_s30 }
 0x63a   : > { %v2036_v53 = vpop.permute.xlu1 %2035  ;;  %v2040_v54 = vpop.permute.xlu0 %2039 }
 0x63b   : > { %v2046_v55 = vsel %vm1257_vm2, %v2030_v52, %v2036_v53 }
 0x63c   : > { %v2048_v57 = vsel %vm2047_vm3, %v2046_v55, %v2040_v54 }
 0x63e   : > { %v2044_v16 = vpop.permute.xlu1 %2043 }
 0x63f   : > { %v2050_v58 = vsel %vm2049_vm4, %v2048_v57, %v2044_v16 }
 0x640   : > { %2472 = vmatmul.mubr.msk.f32.vlgmr.msra.gmra.mxu0 %vm509_vm0, %v2050_v58 }
 0x700   : > { %v2131_v60 = vpop.f32.mrf.mxu0 }
 0x701   : > { %v2132_v61 = vadd.f32 %v2348_v59, %v2131_v60 }
 0x702   : > { %v2473_v62 = vpop.f32.mrf.mxu0 }
 0x703   : > { %v2136_v63 = vadd.f32 %v2132_v61, %v3187_v1 }
 0x705   : > { %2137 = vst.msk [vmem:[%s503_s12] sm:$0xff] %vm509_vm0, %v2136_v63 }
 0x706   : > { %2806 = shalt.err (!%p2803_p7)
}
 0x707   : > { %s2807_s26 = scalar_lea.hbm %s2150_s24, 128  ;;  %s2811_s21 = scalar_lea.hbm %s3509_s18, 256 }
 0x708   : > { %p2808_p3 = scmp.ne.s32.totalorder %s2150_s24, %s2807_s26  ;;  %p2812_p6 = scmp.lt.s32.totalorder %s2150_s24, %s3509_s18 }
 0x709   : > { %p2813_p9 = scmp.lt.s32.totalorder %s2811_s21, %s2807_s26 }
 0x70a   : > { %p2809_p12 = pnand %p2808_p3, %p3510_p1 }
 0x70b   : > { %p2814_p2 = por %p2813_p9, %p2812_p6 }
 0x70c   : > { %p2810_p13 = pneg %p2809_p12 }
 0x70e   : > { %p2815_p5 = pnand %p2814_p2, %p2810_p13 }
 0x710   : > { %2818 = shalt.err (!%p2815_p5)
}
 0x711   : > { %2496 = dma.vmem_to_hbm [thread:$0]  (%p3510_p1), %s2153_s1, 128, %s2150_s24, %s2139_s27  }
 0x712 PF: > { %s3511_s5 = sld [smem:[#allocation20_spill]] }
 0x713   : > { %s3512_s30 = sld [smem:[#allocation24_spill]] }
 0x714   : > { %s3513_s11 = sld [smem:[#allocation21_spill]] }
 0x718   : > { %s2164_s22 = sand.u32 1, %s3511_s5  }
 0x719   : > { %p3514_p8 = scmp.ne.s32.totalorder %s3512_s30, 0  ;;  %s2165_s7 = scalar_lea.sflag [#allocation4], %s2164_s22 }
 0x71a   : > { %p3515_p10 = scmp.ge.s32.totalorder %s3513_s11, 2 }
 0x71c   : > { %p2522_p11 = pnand %p3515_p10, %p3514_p8 }
 0x71e   : > { %p2523_p0 = pneg %p2522_p11 }
 0x720   : > { %2852 = dma.done.wait (%p2523_p0), %s2165_s7, 128  }
 0x721   : > { %2854 = vsyncadd (%p2523_p0), %s2165_s7, 4294967168  ;;  %s3516_s16 = sld [smem:[#allocation22_spill]]  ;;  %s3518_s13 = smov %s2861_s14 }
 0x722   : > { %s3517_s12 = sld [smem:[#allocation23_spill]]  ;;  %s3519_s14 = smov %s2865_s15 }
 0x727   : > { %p28_p4 = scmp.ge.s32.totalorder %s3516_s16, 4  }
 0x728   : > { %s3520_s15 = smov %s3517_s12 }
 0x729   :  { %30 = sbr.rel (!%p28_p4) target bundleno = 15 (0xf), region = 145 }
 0x72e   :  { %2170 = vsyncpa [#allocation3], 1 }
 0x72f   :  { %2172 = vsyncpa [#allocation3 + $0x1], 1 }
 0x730   :  { %2173 = vsyncpa [#allocation6], 1 }
 0x731   :  { %2175 = vsyncpa [#allocation6 + $0x1], 1 }
 0x732   :  { %2176 = vsyncpa [#allocation9], 1 }
 0x733   :  { %2177 = vsyncpa [#allocation12], 1 }
 0x734   :  { %2178 = vsyncpa [#allocation4], 1 }
 0x735   :  { %2180 = vsyncpa [#allocation4 + $0x1], 1 }

// kernel: tpu_custom_call.1
= control target key start
LH: loop header
LB: loop body
LE: loop exit
PB: predicated region body
PF: predicated region fallthrough
CT: control target
= control target key end

     0   :  { %s3444_s0 = inlined_call_operand.hbm [shape: f32[16,32], index: 0, kind: input, shape index: {}]   ;;  %s3445_s1 = inlined_call_operand.hbm [shape: f32[16,32], index: 1, kind: input, shape index: {}]   ;;  %s3446_s2 = inlined_call_operand.hbm [shape: f32[16,32], index: 2, kind: input, shape index: {}]   ;;  %s3447_s3 = inlined_call_operand.vmem [shape: f32[1,32], index: 3, kind: input, shape index: {}]   ;;  %s3448_s4 = inlined_call_operand.vmem [shape: f32[1,32], index: 4, kind: input, shape index: {}]   ;;  %s3449_s5 = inlined_call_operand.hbm [shape: f32[32,32], index: 5, kind: input, shape index: {}]   ;;  %s3450_s6 = inlined_call_operand.hbm [shape: f32[32,32], index: 6, kind: input, shape index: {}]   ;;  %s3451_s7 = inlined_call_operand.hbm [shape: f32[32,32], index: 7, kind: input, shape index: {}]   ;;  %s3452_s8 = inlined_call_operand.hbm [shape: f32[32,32], index: 8, kind: input, shape index: {}]   ;;  %s3453_s9 = inlined_call_operand.vmem [shape: f32[1,32], index: 9, kind: input, shape index: {}]   ;;  %s3454_s10 = inlined_call_operand.hbm [shape: f32[16,32], index: 10, kind: output, shape index: {}]  }
   0x1   :  { %3475 = sst [smem:[#allocation25_spill]] %s3444_s0 }
   0x2   :  { %3476 = sst [smem:[#allocation26_spill]] %s3445_s1 }
   0x3   :  { %3477 = sst [smem:[#allocation27_spill]] %s3449_s5 }
   0x4   :  { %3478 = sst [smem:[#allocation28_spill]] %s3451_s7 }
   0x5   :  { %3479 = sst [smem:[#allocation29_spill]] %s3454_s10 }
   0x6   :  { %15 = vsyncpa [#allocation3], 0 }
   0x7   :  { %17 = vsyncpa [#allocation3 + $0x1], 0 }
   0x8   :  { %18 = vsyncpa [#allocation6], 0 }
   0x9   :  { %20 = vsyncpa [#allocation6 + $0x1], 0 }
   0xa   :  { %21 = vsyncpa [#allocation9], 0 }
   0xb   :  { %22 = vsyncpa [#allocation12], 0 }
   0xc   :  { %23 = vsyncpa [#allocation4], 0 }
   0xd   :  { %25 = vsyncpa [#allocation4 + $0x1], 0  ;;  %s2946_s13 = smov 0   ;;  %s2948_s14 = smov 0  }
   0xe   :  { %s2950_s15 = smov 0   ;;  %s2952_s16 = smov 0  }
   0xf LB: > { %3480 = sst [smem:[#allocation20_spill]] %s2857_s13  ;;  %s2871_s17 = smov [#allocation8]   ;;  %s2869_s16 = sphi %s2952_s16, %s3516_s16   ;;  %s2865_s15 = sphi %s2950_s15, %s3520_s15   ;;  %s2861_s14 = sphi %s2948_s14, %s3519_s14   ;;  %s2857_s13 = sphi %s2946_s13, %s3518_s13  }
  0x10   : > { %3481 = sst [smem:[#allocation21_spill]] %s2869_s16  ;;  %s305_s18 = sshll.u32 %s2871_s17, 4  ;;  %s306_s18 = int_to_ptr.vmem [resolvable:$true] %s305_s18 }
  0x11   : > { %s2967_s19 = sadd.s32 4294967295, %s2869_s16   ;;  %p2304_p0 = scmp.ge.s32.totalorder %s2869_s16, 1 }
  0x12   : > { %p3467_p1 = scmp.eq.s32.totalorder %s2967_s19, 0  ;;  %p287_p2 = scmp.lt.s32.totalorder %s2869_s16, 3 }
  0x13   : > { %s2872_s21 = smov [#allocation11]   ;;  %s2616_s24 = scalar_lea.vmem %s306_s18, 512 }
  0x14   : > { %p2972_p3 = pnand %p2304_p0, %p287_p2  ;;  %s331_s22 = sshll.u32 %s2872_s21, 4  ;;  %s332_s22 = int_to_ptr.vmem [resolvable:$true] %s331_s22 }
  0x15   : > { %p2617_p8 = scmp.ne.s32.totalorder %s306_s18, %s2616_s24  ;;  %p2624_p11 = scmp.lt.s32.totalorder %s306_s18, %s306_s18 }
  0x16   : > { %s3482_s20 = scalar_select %p2972_p3, 1, 0 }
  0x17   : > { %p2498_p5 = pneg %p2972_p3  ;;  %p2625_p12 = scmp.lt.s32.totalorder %s2616_s24, %s2616_s24 }
  0x19   : > { %p2981_p6 = pnand %p2498_p5, %p3467_p1  ;;  %p2626_p13 = por %p2625_p12, %p2624_p11 }
  0x1b   : > { %s3483_s23 = scalar_select %p2981_p6, 1, 0 }
  0x1c   : > { %p3455_p7 = pneg %p2981_p6 }
  0x1e   : > { %p2619_p9 = pnand %p2617_p8, %p3455_p7 }
  0x20   : > { %p2620_p10 = pneg %p2619_p9 }
  0x22   : > { %p2627_p0 = pnand %p2626_p13, %p2620_p10 }
  0x24   : > { %2630 = shalt.err (!%p2627_p0)
}
  0x25   : > { %s3456_s25 = smov 128   ;;  %s3458_s26 = smov 8  }
  0x26   : > { %s3484_s5 = sld [smem:[#allocation27_spill]]  ;;  %s2642_s29 = scalar_lea.vmem %s332_s22, 512 }
  0x27   : > { %p2643_p2 = scmp.ne.s32.totalorder %s332_s22, %s2642_s29  ;;  %p2650_p9 = scmp.lt.s32.totalorder %s332_s22, %s332_s22 }
  0x28   : > { %p2651_p10 = scmp.lt.s32.totalorder %s2642_s29, %s2642_s29 }
  0x29   : > { %p2645_p5 = pnand %p2643_p2, %p3455_p7 }
  0x2a   : > { %p2652_p11 = por %p2651_p10, %p2650_p9 }
  0x2b   : > { %p2646_p8 = pneg %p2645_p5 }
  0x2c   : > { %2501 = dma.hbm_to_vmem [thread:$0]  (!%p2981_p6), %s3484_s5, 512, %s306_s18, [#allocation9], %s3456_s25, %s3456_s25, %s3458_s26  }
  0x2d   : > { %p2653_p12 = pnand %p2652_p11, %p2646_p8 }
  0x2f   : > { %2656 = shalt.err (!%p2653_p12)
}
  0x30   : > { %s3485_s7 = sld [smem:[#allocation28_spill]]  ;;  %s2303_s12 = sadd.s32 4294967294, %s2869_s16  }
  0x31   : > { %s3011_s17 = sadd.s32 1, %s2869_s16   ;;  %s38_s21 = sadd.s32 1, %s2865_s15 }
  0x32   : > { %3486 = sst [smem:[#allocation22_spill]] %s3011_s17  ;;  %s35_s18 = ssub.s32 %s2869_s16, %s3011_s17 }
  0x33   : > { %p36_p13 = scmp.eq.s32.totalorder %s35_s18, 0  ;;  %p45_p0 = scmp.ne.s32.totalorder %s2865_s15, %s2861_s14 }
  0x34   : > { %p46_p2 = scmp.eq.s32.totalorder %s2869_s16, 0  ;;  %p51_p5 = scmp.ne.s32.totalorder %s2861_s14, %s2857_s13 }
  0x35   : > { %s3022_s24 = scalar_select %p36_p13, %s2865_s15, %s38_s21  }
  0x36   : > { %2507 = dma.hbm_to_vmem [thread:$0]  (!%p2981_p6), %s3485_s7, 512, %s332_s22, [#allocation12], %s3456_s25, %s3456_s25, %s3458_s26  }
  0x37   : > { %3487 = sst [smem:[#allocation23_spill]] %s3022_s24  ;;  %p47_p8 = por %p46_p2, %p45_p0 }
  0x38   : > { %p3026_p9 = por %p3467_p1, %p51_p5  ;;  %p274_p10 = scmp.eq.s32.totalorder %s2967_s19, 1 }
  0x39   : > { %p280_p11 = scmp.eq.s32.totalorder %s2303_s12, 1  ;;  %p2529_p12 = scmp.lt.s32.totalorder %s2869_s16, 2 }
  0x3a   : > { %s3488_s27 = scalar_select %p3026_p9, 1, 0 }
  0x3b   : > { %s3460_s22 = sand.u32 1, %s2865_s15   ;;  %p3033_p4 = por %p274_p10, %p45_p0 }
  0x3c   : > { %p3037_p7 = por %p280_p11, %p51_p5  ;;  %s3043_s30 = sshll.u32 %s3460_s22, 3 }
  0x3d   : > { %s3489_s28 = scalar_select %p3033_p4, 1, 0 }
  0x3e   : > { %s3490_s29 = scalar_select %p3037_p7, 1, 0 }
  0x3f   : > { %s3046_s11 = sshll.u32 %s2869_s16, 7  ;;  %p3048_p13 = pnand %p2529_p12, %p47_p8 }
  0x40   : > { %3491 = sst [smem:[#allocation24_spill]] %s3490_s29  ;;  %s379_s12 = sand.u32 1, %s2869_s16  }
  0x41   : > { %s3493_s1 = sld [smem:[#allocation26_spill]]  ;;  %s383_s22 = scalar_lea.vmem [#allocation5], %s3043_s30 }
  0x42   : > { %s390_s5 = sshll.u32 %s383_s22, 4  ;;  %s2875_s7 = smov [#allocation10]   ;;  %s3060_s5 = int_to_ptr.vmem [resolvable:$true] %s390_s5 }
  0x43   : > { %s318_s24 = sshll.u32 %s2875_s7, 4  ;;  %s3062_s17 = scalar_lea.sflag [#allocation6], %s379_s12  ;;  %s319_s24 = int_to_ptr.vmem [resolvable:$true] %s318_s24 }
  0x44   : > { %p3068_p2 = pneg %p3048_p13 }
  0x46   : > { %s3494_s16 = scalar_select %p3068_p2, 1, 0 }
  0x47   : > { %s3057_s26 = scalar_lea.hbm %s3493_s1, %s3046_s11  ;;  %s2662_s22 = scalar_lea.hbm %s3493_s1, 256 }
  0x48   : > { %s2657_s29 = scalar_lea.hbm %s3057_s26, 128  ;;  %p2663_p10 = scmp.lt.s32.totalorder %s3057_s26, %s3493_s1 }
  0x49   : > { %p2658_p0 = scmp.ne.s32.totalorder %s3057_s26, %s2657_s29  ;;  %p2664_p11 = scmp.lt.s32.totalorder %s2662_s22, %s2657_s29 }
  0x4b   : > { %p2660_p5 = pnand %p3068_p2, %p2658_p0  ;;  %p2665_p12 = por %p2664_p11, %p2663_p10 }
  0x4d   : > { %p2661_p8 = pneg %p2660_p5 }
  0x4f   : > { %p2666_p1 = pnand %p2665_p12, %p2661_p8 }
  0x51   : > { %2669 = shalt.err (!%p2666_p1)
}
  0x52   : > { %s2670_s7 = scalar_lea.vmem %s3060_s5, 128  ;;  %s2876_s12 = smov [#allocation5]  }
  0x53   : > { %p2671_p7 = scmp.ne.s32.totalorder %s3060_s5, %s2670_s7  ;;  %s2675_s25 = sshll.u32 %s2876_s12, 4  ;;  %s2676_s25 = int_to_ptr.vmem [resolvable:$false] %s2675_s25 }
  0x54   : > { %s2677_s21 = scalar_lea.vmem %s2676_s25, 256  ;;  %p2678_p4 = scmp.lt.s32.totalorder %s3060_s5, %s2676_s25 }
  0x55   : > { %p2673_p0 = pnand %p2671_p7, %p3068_p2  ;;  %p2679_p9 = scmp.lt.s32.totalorder %s2677_s21, %s2670_s7 }
  0x57   : > { %p2674_p5 = pneg %p2673_p0  ;;  %p2680_p3 = por %p2679_p9, %p2678_p4 }
  0x59   : > { %p2681_p6 = pnand %p2680_p3, %p2674_p5 }
  0x5b   : > { %2684 = shalt.err (!%p2681_p6)
}
  0x5c   : > { %2517 = dma.hbm_to_vmem [thread:$0]  (!%p3048_p13), %s3057_s26, 128, %s3060_s5, %s3062_s17  }
  0x5d   : > { %s2696_s10 = scalar_lea.vmem %s319_s24, 512  ;;  %p3495_p7 = scmp.ne.s32.totalorder %s3483_s23, 0 }
  0x5e   : > { %p2697_p1 = scmp.ne.s32.totalorder %s319_s24, %s2696_s10  ;;  %p2704_p12 = scmp.lt.s32.totalorder %s319_s24, %s319_s24 }
  0x5f   : > { %p3496_p8 = pneg %p3495_p7  ;;  %p2705_p0 = scmp.lt.s32.totalorder %s2696_s10, %s2696_s10 }
  0x61   : > { %p2699_p10 = pnand %p2697_p1, %p3496_p8  ;;  %p2706_p2 = por %p2705_p0, %p2704_p12 }
  0x63   : > { %p2700_p11 = pneg %p2699_p10 }
  0x65   : > { %p2707_p4 = pnand %p2706_p2, %p2700_p11 }
  0x67   : > { %2710 = shalt.err (!%p2707_p4)
}
  0x68   : > { %s3497_s13 = smov 8   ;;  %s3498_s29 = smov 128  }
  0x69   : > { %2504 = dma.hbm_to_vmem [thread:$0]  (!%p3495_p7), %s3450_s6, 512, %s319_s24, [#allocation9], %s3498_s29, %s3498_s29, %s3497_s13  }
  0x6a   : > { %s2877_s5 = smov [#allocation13]   ;;  %p3499_p6 = pmov %p3496_p8 }
  0x6b   : > { %s344_s26 = sshll.u32 %s2877_s5, 4  ;;  %s345_s26 = int_to_ptr.vmem [resolvable:$true] %s344_s26 }
  0x6c   : > { %s2722_s12 = scalar_lea.vmem %s345_s26, 512  ;;  %p2730_p5 = scmp.lt.s32.totalorder %s345_s26, %s345_s26 }
  0x6d   : > { %p2723_p3 = scmp.ne.s32.totalorder %s345_s26, %s2722_s12  ;;  %p2731_p1 = scmp.lt.s32.totalorder %s2722_s12, %s2722_s12 }
  0x6f   : > { %p2725_p9 = pnand %p2723_p3, %p3499_p6  ;;  %p2732_p8 = por %p2731_p1, %p2730_p5 }
  0x71   : > { %p2726_p2 = pneg %p2725_p9 }
  0x73   : > { %p2733_p10 = pnand %p2732_p8, %p2726_p2 }
  0x75   : > { %2736 = shalt.err (!%p2733_p10)
}
  0x76   : > { %2510 = dma.hbm_to_vmem [thread:$0]  (!%p3495_p7), %s3452_s8, 512, %s345_s26, [#allocation12], %s3498_s29, %s3498_s29, %s3497_s13  }
  0x77   : > { %s3500_s0 = sld [smem:[#allocation25_spill]]  ;;  %s365_s23 = scalar_lea.vmem [#allocation2], %s3043_s30 }
  0x78   : > { %s372_s7 = sshll.u32 %s365_s23, 4  ;;  %s3501_s5 = sand.u32 1, %s2865_s15   ;;  %s373_s7 = int_to_ptr.vmem [resolvable:$true] %s372_s7 }
  0x79   : > { %s362_s12 = scalar_lea.sflag [#allocation3], %s3501_s5  ;;  %p3502_p12 = scmp.ne.s32.totalorder %s3494_s16, 0 }
  0x7d   : > { %s3117_s22 = scalar_lea.hbm %s3500_s0, %s3046_s11  ;;  %s2742_s29 = scalar_lea.hbm %s3500_s0, 256 }
  0x7e   : > { %s2737_s1 = scalar_lea.hbm %s3117_s22, 128  ;;  %p2743_p7 = scmp.lt.s32.totalorder %s3117_s22, %s3500_s0 }
  0x7f   : > { %p2738_p11 = scmp.ne.s32.totalorder %s3117_s22, %s2737_s1  ;;  %p2744_p3 = scmp.lt.s32.totalorder %s2742_s29, %s2737_s1 }
  0x81   : > { %p2740_p0 = pnand %p2738_p11, %p3502_p12  ;;  %p2745_p6 = por %p2744_p3, %p2743_p7 }
  0x83   : > { %p2741_p4 = pneg %p2740_p0 }
  0x85   : > { %p2746_p9 = pnand %p2745_p6, %p2741_p4 }
  0x87   : > { %2749 = shalt.err (!%p2746_p9)
}
  0x88   : > { %s2750_s21 = scalar_lea.vmem %s373_s7, 128  ;;  %s2878_s10 = smov [#allocation2]  }
  0x89   : > { %p2751_p2 = scmp.ne.s32.totalorder %s373_s7, %s2750_s21  ;;  %s2755_s23 = sshll.u32 %s2878_s10, 4  ;;  %s2756_s23 = int_to_ptr.vmem [resolvable:$false] %s2755_s23 }
  0x8a   : > { %s2757_s5 = scalar_lea.vmem %s2756_s23, 256  ;;  %p2758_p8 = scmp.lt.s32.totalorder %s373_s7, %s2756_s23 }
  0x8b   : > { %p2753_p5 = pnand %p2751_p2, %p3502_p12  ;;  %p2759_p10 = scmp.lt.s32.totalorder %s2757_s5, %s2750_s21 }
  0x8d   : > { %p2754_p1 = pneg %p2753_p5  ;;  %p2760_p11 = por %p2759_p10, %p2758_p8 }
  0x8f   : > { %p2761_p0 = pnand %p2760_p11, %p2754_p1 }
  0x91   : > { %2764 = shalt.err (!%p2761_p0)
}
  0x92   : > { %2514 = dma.hbm_to_vmem [thread:$0]  (!%p3048_p13), %s3117_s22, 128, %s373_s7, %s362_s12  }
  0x93   : > { %s406_s13 = scalar_lea.hbm %s3446_s2, %s3046_s11  ;;  %s401_s29 = scalar_lea.vmem [#allocation7], %s3043_s30 }
  0x94   : > { %s408_s26 = sshll.u32 %s401_s29, 4  ;;  %s2765_s25 = scalar_lea.hbm %s406_s13, 128  ;;  %s409_s26 = int_to_ptr.vmem [resolvable:$true] %s408_s26 }
  0x95   : > { %p2766_p4 = scmp.ne.s32.totalorder %s406_s13, %s2765_s25  ;;  %s2770_s23 = scalar_lea.hbm %s3446_s2, 256 }
  0x96   : > { %p2771_p6 = scmp.lt.s32.totalorder %s406_s13, %s3446_s2  ;;  %p2772_p9 = scmp.lt.s32.totalorder %s2770_s23, %s2765_s25 }
  0x97   : > { %p2768_p7 = pnand %p2766_p4, %p3502_p12 }
  0x98   : > { %p2773_p2 = por %p2772_p9, %p2771_p6 }
  0x99   : > { %p2769_p3 = pneg %p2768_p7 }
  0x9b   : > { %p2774_p5 = pnand %p2773_p2, %p2769_p3 }
  0x9d   : > { %2777 = shalt.err (!%p2774_p5)
}
  0x9e   : > { %s2778_s30 = scalar_lea.vmem %s409_s26, 128  ;;  %s2879_s11 = smov [#allocation7]  }
  0x9f   : > { %p2779_p1 = scmp.ne.s32.totalorder %s409_s26, %s2778_s30  ;;  %s2783_s22 = sshll.u32 %s2879_s11, 4  ;;  %s2784_s22 = int_to_ptr.vmem [resolvable:$false] %s2783_s22 }
  0xa0   : > { %s2785_s7 = scalar_lea.vmem %s2784_s22, 256  ;;  %p2786_p11 = scmp.lt.s32.totalorder %s409_s26, %s2784_s22 }
  0xa1   : > { %p2781_p8 = pnand %p2779_p1, %p3502_p12  ;;  %p2787_p0 = scmp.lt.s32.totalorder %s2785_s7, %s2778_s30 }
  0xa3   : > { %p2782_p10 = pneg %p2781_p8  ;;  %p2788_p4 = por %p2787_p0, %p2786_p11 }
  0xa5   : > { %p2789_p7 = pnand %p2788_p4, %p2782_p10 }
  0xa7   : > { %2792 = shalt.err (!%p2789_p7)
}
  0xa8   : > { %2520 = dma.hbm_to_vmem [thread:$0]  (!%p3048_p13), %s406_s13, 128, %s409_s26, %s3062_s17  }
  0xa9   : > { %p3503_p3 = scmp.ne.s32.totalorder %s3482_s20, 0 }
  0xaa   : > { %s3159_s0 = sand.u32 (!%p3503_p3), 1, %s2861_s14   ;;  %p3504_p12 = scmp.ne.s32.totalorder (!%p3503_p3), %s3488_s27, 0 }
  0xab   : > { %417 = sbr.rel (%p3503_p3) target bundleno = 1810 (0x712), region = 60  ;;  %s3162_s16 = sshll.u32 (!%p3503_p3), %s3159_s0, 3 }
  0xac   : > { %s420_s12 = scalar_lea.sflag (!%p3503_p3), [#allocation3], %s3159_s0  ;;  %s423_s1 = scalar_lea.vmem (!%p3503_p3), [#allocation2], %s3162_s16 }
  0xb0   : > { %2836 = dma.done.wait (%p3504_p12), %s420_s12, 128  }
  0xb1   : > { %2838 = vsyncadd (%p3504_p12), %s420_s12, 4294967168  ;;  %s428_s20 = sand.u32 1, %s2967_s19   ;;  %s432_s18 = scalar_lea.vmem [#allocation5], %s3162_s16 }
  0xb2   : > { %s429_s17 = scalar_lea.sflag [#allocation6], %s428_s20 }
  0xb3   : > { %2840 = dma.done.wait (%p3504_p12), %s429_s17, 256  }
  0xb4   : > { %2842 = vsyncadd (%p3504_p12), %s429_s17, 4294967040  ;;  %s441_s24 = scalar_lea.vmem [#allocation7], %s3162_s16  ;;  %p3505_p13 = scmp.eq.s32.totalorder %s2967_s19, 0 }
  0xb6   : > { %2844 = dma.done.wait (%p3505_p13), [#allocation9], 1024   ;;  %p3506_p6 = pmov %p3505_p13 }
  0xb8   : > { %2846 = vsyncadd (%p3506_p6), [#allocation9], 4294966272  ;;  %p3507_p9 = pmov %p3506_p6 }
  0xb9   : > { %p3508_p2 = pmov %p3506_p6 }
  0xba   : > { %2848 = dma.done.wait (%p3507_p9), [#allocation12], 1024  }
  0xbb   : > { %2850 = vsyncadd (%p3508_p2), [#allocation12], 4294966272  ;;  %vm509_vm0 = vcmask 261120   ;;  %v3185_v0 = vld [vmem:[%s432_s18] sm:$0xff]  ;;  %v3187_v1 = vld [vmem:[%s423_s1] sm:$0xff]  ;;  %v2880_v10 = vmov 0.0   ;;  %v527_v31 = vlaneseq }
  0xbc   : > { %v541_v2 = vsel %vm509_vm0, %v3185_v0, 0.0  ;;  %v510_v3 = vsel %vm509_vm0, %v3187_v1, 0.0  ;;  %v545_v4 = vmul.f32 %v3185_v0, %v3185_v0  ;;  %v515_v5 = vmul.f32 %v3187_v1, %v3187_v1  ;;  %v591_v8 = vld [vmem:[#allocation8 + $0x18] sm:$0xff]  ;;  %2390 = vmatprep.subr.mxu0 %v2880_v10  ;;  %2401 = vmatprep.subr.mxu1 %v2880_v10  ;;  %v590_v11 = vld [vmem:[#allocation8 + $0x10] sm:$0xff]  ;;  %v589_v13 = vld [vmem:[#allocation8 + $0x8] sm:$0xff]  ;;  %s2882_s25 = smov 112  }
  0xbd   : > { %542 = vadd.xlane.f32.xlu0 %v541_v2  ;;  %511 = vadd.xlane.f32.xlu1 %v510_v3  ;;  %v668_v9 = vld [vmem:[#allocation10 + $0x18] sm:$0xff]  ;;  %v667_v12 = vld [vmem:[#allocation10 + $0x10] sm:$0xff]  ;;  %v666_v14 = vld [vmem:[#allocation10 + $0x8] sm:$0xff]  ;;  %vm2881_vm1 = vmmov 0   ;;  %v3213_v32 = vshrl.u32 %v527_v31, 7  ;;  %s2883_s21 = smov 120  }
  0xbe   : > { %v546_v6 = vsel %vm509_vm0, %v545_v4, 0.0  ;;  %v516_v7 = vsel %vm509_vm0, %v515_v5, 0.0  ;;  %2391 = vmatpush3.msra.mxu0 %v591_v8  ;;  %2402 = vmatpush3.msra.mxu1 %v668_v9  ;;  %v588_v15 = vld [vmem:[#allocation8] sm:$0xff]  ;;  %v504_v33 = vld [vmem:[%s3447_s3] sm:$0x1]  ;;  %s2884_s10 = smov 104  }
  0xbf   : > { %2392 = vmatprep.subr.mxu0 %v2880_v10  ;;  %2403 = vmatprep.subr.mxu1 %v2880_v10  ;;  %v665_v16 = vld [vmem:[#allocation10] sm:$0xff]  ;;  %v505_v34 = vld [vmem:[%s3448_s4] sm:$0x1]  ;;  %v529_v35 = vsub.s32 0, %v3213_v32  ;;  %v507_v36 = vmul.f32 0.35355338, %v504_v33 }
  0xc0   : > { %2393 = vmatpush3.msra.mxu0 %v590_v11  ;;  %2404 = vmatpush3.msra.mxu1 %v667_v12  ;;  %v508_v37 = vmul.f32 0.35355338, %v505_v34  ;;  %v3249_v56 = vld [vmem:[%s441_s24] sm:$0xff]  ;;  %v743_v62 = vld [vmem:[#allocation11 + $0x8] sm:$0xff]  ;;  %v742_v63 = vld [vmem:[#allocation11] sm:$0xff]  ;;  %vm1257_vm2 = vcmask 64512  }
  0xc1   : > { %547 = vadd.xlane.f32.xlu0 %v546_v6  ;;  %517 = vadd.xlane.f32.xlu1 %v516_v7  ;;  %v3223_v39 = vrot.slane %v504_v33, %v529_v35  ;;  %v530_v42 = vrot.slane %v507_v36, %v529_v35  ;;  %v3226_v45 = vrot.slane %v505_v34, %v529_v35  ;;  %v571_v57 = vsel %vm509_vm0, %v3249_v56, 0.0  ;;  %v745_v60 = vld [vmem:[#allocation11 + $0x18] sm:$0xff]  ;;  %v744_v61 = vld [vmem:[#allocation11 + $0x10] sm:$0xff]  ;;  %s2887_s23 = smov 16   ;;  %s2888_s5 = smov 8  }
  0xc2   : > { %2394 = vmatprep.subr.mxu0 %v2880_v10  ;;  %2405 = vmatprep.subr.mxu1 %v2880_v10  ;;  %v537_v47 = vrot.slane %v508_v37, %v529_v35  ;;  %v575_v58 = vmul.f32 %v3249_v56, %v3249_v56  ;;  %v2886_v3 = vmov 1934713408   ;;  %s2889_s30 = smov 24   ;;  %vm2047_vm3 = vcmask 130048   ;;  %s2351_s7 = sshll.u32 %s2967_s19, 7 }
  0xc3   : > { %2395 = vmatpush3.msra.mxu0 %v589_v13  ;;  %2406 = vmatpush3.msra.mxu1 %v666_v14  ;;  %v864_v4 = vunpack.c.l.s4 %v2886_v3  ;;  %vm2049_vm4 = vcmask 195584   ;;  %s503_s12 = scalar_lea.vmem [#allocation14], %s3162_s16  ;;  %s3509_s18 = sld [smem:[#allocation29_spill]] }
  0xc4   : > { %2396 = vmatprep.subr.mxu0 %v2880_v10  ;;  %2407 = vmatprep.subr.mxu1 %v2880_v10  ;;  %v576_v59 = vsel %vm509_vm0, %v575_v58, 0.0  ;;  %s2152_s1 = sshll.u32 %s503_s12, 4  ;;  %s2139_s27 = scalar_lea.sflag [#allocation4], %s3159_s0  ;;  %s2153_s1 = int_to_ptr.vmem [resolvable:$true] %s2152_s1 }
  0xc5   : > { %2397 = vmatpush3.msra.mxu0 %v588_v15  ;;  %2398 = vmatprep.mubr.msk.f32.mxu0 %vm2881_vm1, %v2880_v10  ;;  %v865_v7 = vunpack.c.0.s8 %v864_v4  ;;  %s2793_s13 = scalar_lea.vmem %s2153_s1, 128  ;;  %p3510_p1 = scmp.ne.s32.totalorder %s3489_s28, 0 }
  0xc6   : > { %2408 = vmatpush3.msra.mxu1 %v665_v16  ;;  %2409 = vmatprep.mubr.msk.f32.mxu1 %vm2881_vm1, %v2880_v10  ;;  %p2794_p5 = scmp.ne.s32.totalorder %s2153_s1, %s2793_s13  ;;  %s2890_s19 = smov [#allocation14]  }
  0xc7   : > { %2423 = vmatprep.subr.mxu1 %v2880_v10  ;;  %2412 = vmatprep.subr.mxu0 %v2880_v10  ;;  %v3264_v16 = vsub.s32 %v865_v7, %v3213_v32  ;;  %s2797_s16 = sshll.u32 %s2890_s19, 4  ;;  %s2798_s16 = int_to_ptr.vmem [resolvable:$false] %s2797_s16 }
  0xc8   : > { %p2795_p8 = pnand %p2794_p5, %p3510_p1  ;;  %s2799_s29 = scalar_lea.vmem %s2798_s16, 256 }
  0xc9   : > { %s2150_s24 = scalar_lea.hbm %s3509_s18, %s2351_s7  ;;  %p2800_p11 = scmp.lt.s32.totalorder %s2153_s1, %s2798_s16 }
  0xca   : > { %p2796_p10 = pneg %p2795_p8  ;;  %p2801_p0 = scmp.lt.s32.totalorder %s2799_s29, %s2793_s13 }
  0xcc   : > { %p2802_p4 = por %p2801_p0, %p2800_p11 }
  0xce   : > { %p2803_p7 = pnand %p2802_p4, %p2796_p10 }
 0x146   : > { %v543_v17 = vpop.xlane.xlu0 %542  ;;  %v512_v18 = vpop.xlane.xlu1 %511 }
 0x147   : > { %v544_v19 = vmul.f32 0.03125, %v543_v17  ;;  %v514_v20 = vmul.f32 0.03125, %v512_v18 }
 0x149   : > { %v520_v21 = vmul.f32 %v514_v20, %v514_v20  ;;  %v550_v24 = vmul.f32 %v544_v19, %v544_v19  ;;  %v554_v38 = vsub.f32 %v3185_v0, %v544_v19  ;;  %v524_v41 = vsub.f32 %v3187_v1, %v514_v20 }
 0x14a   : > { %v548_v22 = vpop.xlane.xlu0 %547  ;;  %v518_v23 = vpop.xlane.xlu1 %517  ;;  %v2885_v0 = vmov 1983009808  }
 0x14b   : > { %v549_v25 = vmul.f32 0.03125, %v548_v22  ;;  %v519_v26 = vmul.f32 0.03125, %v518_v23  ;;  %v832_v2 = vunpack.c.l.s4 %v2885_v0 }
 0x14d   : > { %v551_v27 = vsub.f32 %v549_v25, %v550_v24  ;;  %v521_v28 = vsub.f32 %v519_v26, %v520_v21  ;;  %v833_v5 = vunpack.c.0.s8 %v832_v2 }
 0x14f   : > { %v552_v29 = vadd.f32 1e-05, %v551_v27  ;;  %v522_v30 = vadd.f32 1e-05, %v521_v28  ;;  %v3261_v8 = vsub.s32 %v833_v5, %v3213_v32 }
 0x151   : > { %2583 = vrsqrt.f32 %v552_v29 }
 0x152   : > { %2585 = vrsqrt.f32 %v522_v30 }
 0x15e   : > { %v2584_v40 = vpop.eup %2583 }
 0x15f   : > { %v2586_v43 = vpop.eup %2585  ;;  %v555_v44 = vmul.f32 %v2584_v40, %v554_v38 }
 0x160   : > { %v525_v46 = vmul.f32 %v2586_v43, %v524_v41 }
 0x161   : > { %v562_v48 = vmul.f32 %v3223_v39, %v555_v44 }
 0x162   : > { %v532_v49 = vmul.f32 %v530_v42, %v525_v46 }
 0x163   : > { %v569_v50 = vadd.f32 %v3226_v45, %v562_v48 }
 0x164   : > { %v539_v51 = vadd.f32 %v537_v47, %v532_v49 }
 0x165   : > { %2410 = vmatmul.mubr.msk.f32.vlgmr.msra.gmra.mxu1 %vm509_vm0, %v569_v50 }
 0x166   : > { %2399 = vmatmul.mubr.msk.f32.vlgmr.msra.gmra.mxu0 %vm509_vm0, %v539_v51  ;;  %2425 = vmatprep.mubr.msk.f32.mxu1 %vm2881_vm1, %v2880_v10 }
 0x167   : > { %2420 = vmatprep.mubr.msk.f32.mxu0 %vm2881_vm1, %v2880_v10  ;;  %2413 = vmatpush3.msra.mxu0 %v745_v60 }
 0x168   : > { %2414 = vmatprep.subr.mxu0 %v2880_v10 }
 0x169   : > { %2415 = vmatpush3.msra.mxu0 %v744_v61 }
 0x16a   : > { %2416 = vmatprep.subr.mxu0 %v2880_v10 }
 0x16b   : > { %2417 = vmatpush3.msra.mxu0 %v743_v62 }
 0x16c   : > { %2418 = vmatprep.subr.mxu0 %v2880_v10 }
 0x16d   : > { %2419 = vmatpush3.msra.mxu0 %v742_v63 }
 0x16e   : > { %2443 = vmatprep.subr.mxu0 %v2880_v10 }
 0x225   : > { %v738_v52 = vpop.f32.mrf.mxu1 }
 0x226   : > { %v3236_v53 = vpop.f32.mrf.mxu0  ;;  %969 = vrot.lane.b32.xlu1 %v738_v52, %s2882_s25  ;;  %966 = vrot.lane.b32.xlu0 %v738_v52, %s2883_s21 }
 0x227   : > { %v2411_v54 = vpop.f32.mrf.mxu1 }
 0x228   : > { %v2400_v55 = vpop.f32.mrf.mxu0 }
 0x22a   : > { %972 = vrot.lane.b32.xlu1 %v738_v52, %s2884_s10  ;;  %823 = vrot.lane.b32.xlu0 %v3236_v53, %s2882_s25 }
 0x22e   : > { %820 = vrot.lane.b32.xlu1 %v3236_v53, %s2883_s21 }
 0x232   : > { %826 = vrot.lane.b32.xlu1 %v3236_v53, %s2884_s10 }
 0x249   : > { %572 = vadd.xlane.f32.xlu0 %v571_v57 }
 0x256   : > { %577 = vadd.xlane.f32.xlu1 %v576_v59 }
 0x298   : > { %v970_v6 = vpop.permute.xlu1 %969  ;;  %v967_v12 = vpop.permute.xlu0 %966 }
 0x299   : > { %v975_v9 = vcombine.low %v738_v52, %v970_v6  ;;  %v976_v11 = vcombine.high %v738_v52, %v970_v6 }
 0x29b   : > { %v983_v17 = vrot.slane %v975_v9, %v3261_v8  ;;  %v990_v18 = vrot.slane %v976_v11, %v3261_v8 }
 0x29c   : > { %v973_v13 = vpop.permute.xlu1 %972  ;;  %v824_v26 = vpop.permute.xlu0 %823 }
 0x29d   : > { %v991_v14 = vcombine.low %v967_v12, %v973_v13  ;;  %v992_v15 = vcombine.high %v967_v12, %v973_v13  ;;  %v829_v31 = vcombine.low %v3236_v53, %v824_v26  ;;  %v830_v32 = vcombine.high %v3236_v53, %v824_v26 }
 0x29f   : > { %v999_v19 = vrot.slane %v991_v14, %v3261_v8  ;;  %v1006_v20 = vrot.slane %v992_v15, %v3261_v8  ;;  %v837_v46 = vrot.slane %v829_v31, %v3261_v8  ;;  %v844_v47 = vrot.slane %v830_v32, %v3261_v8 }
 0x2a0   : > { %v821_v21 = vpop.permute.xlu1 %820 }
 0x2a1   : > { %v1007_v22 = vcombine.low %v983_v17, %v999_v19  ;;  %v1008_v23 = vcombine.high %v983_v17, %v999_v19  ;;  %v1023_v24 = vcombine.low %v990_v18, %v1006_v20  ;;  %v1024_v25 = vcombine.high %v990_v18, %v1006_v20 }
 0x2a3   : > { %v1015_v27 = vrot.slane %v1007_v22, %v3264_v16  ;;  %v1022_v28 = vrot.slane %v1008_v23, %v3264_v16  ;;  %v1031_v29 = vrot.slane %v1023_v24, %v3264_v16  ;;  %v1038_v30 = vrot.slane %v1024_v25, %v3264_v16 }
 0x2a4   : > { %v827_v33 = vpop.permute.xlu1 %826 }
 0x2a5   : > { %v1043_v34 = vcombine.low %v1015_v27, %v1022_v28  ;;  %v2330_v35 = vcombine.high %v1015_v27, %v1022_v28  ;;  %v1059_v36 = vcombine.low %v1031_v29, %v1038_v30  ;;  %v2331_v37 = vcombine.high %v1031_v29, %v1038_v30 }
 0x2a6   : > { %v845_v38 = vcombine.low %v821_v21, %v827_v33  ;;  %v846_v40 = vcombine.high %v821_v21, %v827_v33 }
 0x2a7   : > { %v1050_v41 = vrot.slane %v1043_v34, %v3261_v8  ;;  %v1058_v42 = vrot.slane %v2330_v35, %v3261_v8  ;;  %v1066_v43 = vrot.slane %v1059_v36, %v3261_v8  ;;  %v1074_v44 = vrot.slane %v2331_v37, %v3261_v8 }
 0x2a8   : > { %v853_v48 = vrot.slane %v845_v38, %v3261_v8  ;;  %v860_v49 = vrot.slane %v846_v40, %v3261_v8 }
 0x2a9   : > { %v1075_v50 = vcombine.low %v1050_v41, %v1058_v42  ;;  %v1091_v51 = vcombine.low %v1066_v43, %v1074_v44  ;;  %v1076_v13 = vcombine.high %v1050_v41, %v1058_v42  ;;  %v1092_v14 = vcombine.high %v1066_v43, %v1074_v44 }
 0x2aa   : > { %v861_v52 = vcombine.low %v837_v46, %v853_v48  ;;  %v862_v53 = vcombine.high %v837_v46, %v853_v48  ;;  %v877_v54 = vcombine.low %v844_v47, %v860_v49  ;;  %v878_v55 = vcombine.high %v844_v47, %v860_v49 }
 0x2ab   : > { %v1083_v57 = vrot.slane %v1075_v50, %v3264_v16  ;;  %v1099_v58 = vrot.slane %v1091_v51, %v3264_v16  ;;  %v1090_v22 = vrot.slane %v1076_v13, %v3264_v16  ;;  %v1106_v23 = vrot.slane %v1092_v14, %v3264_v16 }
 0x2ac   : > { %v869_v59 = vrot.slane %v861_v52, %v3264_v16  ;;  %v876_v60 = vrot.slane %v862_v53, %v3264_v16  ;;  %v885_v61 = vrot.slane %v877_v54, %v3264_v16  ;;  %v892_v62 = vrot.slane %v878_v55, %v3264_v16 }
 0x2ad   : > { %v1107_v63 = vcombine.low %v1083_v57, %v1099_v58  ;;  %v1108_v21 = vcombine.high %v1083_v57, %v1099_v58  ;;  %v1109_v27 = vcombine.low %v1090_v22, %v1106_v23  ;;  %v1110_v29 = vcombine.high %v1090_v22, %v1106_v23 }
 0x2ae   : > { %v897_v0 = vcombine.low %v869_v59, %v876_v60  ;;  %v2328_v2 = vcombine.high %v869_v59, %v876_v60  ;;  %v913_v3 = vcombine.low %v885_v61, %v892_v62  ;;  %v2329_v4 = vcombine.high %v885_v61, %v892_v62 }
 0x2af   : > { %2424 = vmatpush3.xpose.msk.msra.mxu1 %vm1257_vm2, %v1107_v63 }
 0x2b0   : > { %v904_v5 = vrot.slane %v897_v0, %v3261_v8  ;;  %v912_v6 = vrot.slane %v2328_v2, %v3261_v8  ;;  %v920_v7 = vrot.slane %v913_v3, %v3261_v8  ;;  %v928_v9 = vrot.slane %v2329_v4, %v3261_v8  ;;  %2428 = vmatprep.subr.mxu1 %v2880_v10 }
 0x2b2   : > { %v929_v11 = vcombine.low %v904_v5, %v912_v6  ;;  %v945_v12 = vcombine.low %v920_v7, %v928_v9  ;;  %v930_v18 = vcombine.high %v904_v5, %v912_v6  ;;  %v946_v19 = vcombine.high %v920_v7, %v928_v9 }
 0x2b4   : > { %v937_v15 = vrot.slane %v929_v11, %v3264_v16  ;;  %v953_v17 = vrot.slane %v945_v12, %v3264_v16  ;;  %v944_v25 = vrot.slane %v930_v18, %v3264_v16  ;;  %v960_v26 = vrot.slane %v946_v19, %v3264_v16 }
 0x2b6   : > { %v961_v20 = vcombine.low %v937_v15, %v953_v17  ;;  %v962_v24 = vcombine.high %v937_v15, %v953_v17  ;;  %v963_v28 = vcombine.low %v944_v25, %v960_v26  ;;  %v964_v30 = vcombine.high %v944_v25, %v960_v26 }
 0x2b8   : > { %2426 = vmatmul.mubr.msk.f32.vlgmr.msra.gmra.mxu1 %vm1257_vm2, %v961_v20 }
 0x2b9   : > { %2429 = vmatpush3.xpose.msk.msra.mxu1 %vm1257_vm2, %v1108_v21  ;;  %2430 = vmatprep.mubr.msk.f32.mxu1 %vm2881_vm1, %v2880_v10 }
 0x2ba   : > { %2433 = vmatprep.subr.mxu1 %v2880_v10 }
 0x2bc   : > { %2431 = vmatmul.mubr.msk.f32.vlgmr.msra.gmra.mxu1 %vm1257_vm2, %v962_v24 }
 0x2bd   : > { %2434 = vmatpush3.xpose.msk.msra.mxu1 %vm1257_vm2, %v1109_v27  ;;  %2435 = vmatprep.mubr.msk.f32.mxu1 %vm2881_vm1, %v2880_v10 }
 0x2be   : > { %2438 = vmatprep.subr.mxu1 %v2880_v10 }
 0x2c0   : > { %2436 = vmatmul.mubr.msk.f32.vlgmr.msra.gmra.mxu1 %vm1257_vm2, %v963_v28 }
 0x2c1   : > { %2439 = vmatpush3.xpose.msk.msra.mxu1 %vm1257_vm2, %v1110_v29  ;;  %2440 = vmatprep.mubr.msk.f32.mxu1 %vm2881_vm1, %v2880_v10 }
 0x2c2   : > { %2448 = vmatprep.subr.mxu1 %v2880_v10 }
 0x2c4   : > { %2441 = vmatmul.mubr.msk.f32.vlgmr.msra.gmra.mxu1 %vm1257_vm2, %v964_v30 }
 0x2c5   : > { %2450 = vmatprep.mubr.msk.f32.mxu1 %vm2881_vm1, %v2880_v10 }
 0x2d2   : > { %v573_v31 = vpop.xlane.xlu0 %572 }
 0x2d3   : > { %v574_v32 = vmul.f32 0.03125, %v573_v31 }
 0x2d5   : > { %v580_v33 = vmul.f32 %v574_v32, %v574_v32  ;;  %v584_v38 = vsub.f32 %v3249_v56, %v574_v32 }
 0x2df   : > { %v578_v34 = vpop.xlane.xlu1 %577 }
 0x2e0   : > { %v579_v35 = vmul.f32 0.03125, %v578_v34 }
 0x2e2   : > { %v581_v36 = vsub.f32 %v579_v35, %v580_v33 }
 0x2e4   : > { %v582_v37 = vadd.f32 1e-05, %v581_v36 }
 0x2e6   : > { %2587 = vrsqrt.f32 %v582_v37 }
 0x2f3   : > { %v2588_v40 = vpop.eup %2587 }
 0x2f4   : > { %v585_v41 = vmul.f32 %v2588_v40, %v584_v38 }
 0x2f6   : > { %v586_v42 = vmul.f32 %v585_v41, %v3223_v39 }
 0x2f8   : > { %v587_v43 = vadd.f32 %v586_v42, %v3226_v45 }
 0x2fa   : > { %2421 = vmatmul.mubr.msk.f32.vlgmr.msra.gmra.mxu0 %vm509_vm0, %v587_v43 }
 0x2fb   : > { %2445 = vmatprep.mubr.msk.f32.mxu0 %vm2881_vm1, %v2880_v10 }
 0x378   : > { %v1330_v44 = vpop.f32.mrf.mxu1 }
 0x379   : > { %v1562_v46 = vsel %vm1257_vm2, %v1330_v44, -inf }
 0x37a   : > { %1563 = vmax.xlane.f32.xlu0 %v1562_v46  ;;  %v2427_v47 = vpop.f32.mrf.mxu1 }
 0x37c   : > { %v1406_v48 = vpop.f32.mrf.mxu1 }
 0x37d   : > { %v1565_v49 = vsel %vm1257_vm2, %v1406_v48, -inf }
 0x37e   : > { %1566 = vmax.xlane.f32.xlu0 %v1565_v49  ;;  %v2432_v56 = vpop.f32.mrf.mxu1 }
 0x380   : > { %v1482_v50 = vpop.f32.mrf.mxu1 }
 0x381   : > { %v1568_v39 = vsel %vm1257_vm2, %v1482_v50, -inf }
 0x382   : > { %1569 = vmax.xlane.f32.xlu0 %v1568_v39  ;;  %v2437_v45 = vpop.f32.mrf.mxu1 }
 0x384   : > { %v1558_v51 = vpop.f32.mrf.mxu1 }
 0x385   : > { %v1571_v52 = vsel %vm1257_vm2, %v1558_v51, -inf }
 0x386   : > { %1572 = vmax.xlane.f32.xlu1 %v1571_v52  ;;  %v2442_v53 = vpop.f32.mrf.mxu1 }
 0x3ba   : > { %v815_v54 = vpop.f32.mrf.mxu0 }
 0x3bc   : > { %v2422_v55 = vpop.f32.mrf.mxu0 }
 0x403   : > { %v1564_v57 = vpop.xlane.xlu0 %1563 }
 0x404   : > { %v1574_v58 = vsub.f32 %v1330_v44, %v1564_v57 }
 0x406   : > { %v1578_v59 = vmul.f32 1.442695, %v1574_v58 }
 0x407   : > { %v1567_v60 = vpop.xlane.xlu0 %1566 }
 0x408   : > { %2589 = vpow2.f32 %v1578_v59  ;;  %v1575_v61 = vsub.f32 %v1406_v48, %v1567_v60 }
 0x40a   : > { %v1580_v62 = vmul.f32 1.442695, %v1575_v61 }
 0x40b   : > { %v1570_v63 = vpop.xlane.xlu0 %1569 }
 0x40c   : > { %2591 = vpow2.f32 %v1580_v62  ;;  %v1576_v0 = vsub.f32 %v1482_v50, %v1570_v63 }
 0x40e   : > { %v1582_v2 = vmul.f32 1.442695, %v1576_v0 }
 0x40f   : > { %v1573_v11 = vpop.xlane.xlu1 %1572 }
 0x410   : > { %2593 = vpow2.f32 %v1582_v2  ;;  %v1577_v12 = vsub.f32 %v1558_v51, %v1573_v11 }
 0x412   : > { %v1584_v13 = vmul.f32 1.442695, %v1577_v12 }
 0x414   : > { %2595 = vpow2.f32 %v1584_v13 }
 0x415   : > { %v3330_v3 = vpop.eup %2589 }
 0x416   : > { %v1586_v4 = vsel %vm1257_vm2, %v3330_v3, 0.0 }
 0x417   : > { %1587 = vadd.xlane.f32.xlu0 %v1586_v4 }
 0x419   : > { %v3334_v5 = vpop.eup %2591 }
 0x41a   : > { %v1589_v6 = vsel %vm1257_vm2, %v3334_v5, 0.0 }
 0x41b   : > { %1590 = vadd.xlane.f32.xlu1 %v1589_v6 }
 0x41d   : > { %v3338_v7 = vpop.eup %2593 }
 0x41e   : > { %v1592_v9 = vsel %vm1257_vm2, %v3338_v7, 0.0 }
 0x41f   : > { %1593 = vadd.xlane.f32.xlu0 %v1592_v9 }
 0x421   : > { %v3344_v14 = vpop.eup %2595 }
 0x422   : > { %v1595_v15 = vsel %vm1257_vm2, %v3344_v14, 0.0 }
 0x42c   : > { %1115 = vrot.lane.b32.xlu1 %v815_v54, %s2882_s25 }
 0x435   : > { %1112 = vrot.lane.b32.xlu0 %v815_v54, %s2883_s21 }
 0x450   : > { %1596 = vadd.xlane.f32.xlu1 %v1595_v15 }
 0x461   : > { %1118 = vrot.lane.b32.xlu1 %v815_v54, %s2884_s10 }
 0x4a0   : > { %v1588_v18 = vpop.xlane.xlu0 %1587 }
 0x4a1   : > { %2597 = vrcp.f32 %v1588_v18 }
 0x4a4   : > { %v1591_v17 = vpop.xlane.xlu1 %1590 }
 0x4a5   : > { %2599 = vrcp.f32 %v1591_v17 }
 0x4a8   : > { %v1116_v19 = vpop.permute.xlu1 %1115  ;;  %v1594_v20 = vpop.xlane.xlu0 %1593 }
 0x4a9   : > { %v1121_v22 = vcombine.low %v815_v54, %v1116_v19  ;;  %v1122_v23 = vcombine.high %v815_v54, %v1116_v19  ;;  %2601 = vrcp.f32 %v1594_v20 }
 0x4ab   : > { %v1129_v28 = vrot.slane %v1121_v22, %v3261_v8  ;;  %v1136_v29 = vrot.slane %v1122_v23, %v3261_v8 }
 0x4ac   : > { %v1113_v24 = vpop.permute.xlu0 %1112 }
 0x4ae   : > { %v2598_v51 = vpop.eup %2597 }
 0x4af   : > { %v1602_v61 = vmul.f32 %v2598_v51, %v3330_v3 }
 0x4b2   : > { %v2600_v52 = vpop.eup %2599 }
 0x4b3   : > { %v1603_v62 = vmul.f32 %v2600_v52, %v3334_v5  ;;  %v2054_v5 = vld [vmem:[#allocation13 + $0x18] sm:$0xff] }
 0x4b6   : > { %v2602_v58 = vpop.eup %2601 }
 0x4b7   : > { %v1604_v4 = vmul.f32 %v2602_v58, %v3338_v7 }
 0x4d9   : > { %v1597_v21 = vpop.xlane.xlu1 %1596 }
 0x4da   : > { %2603 = vrcp.f32 %v1597_v21 }
 0x4dd   : > { %v1119_v25 = vpop.permute.xlu1 %1118 }
 0x4de   : > { %v1137_v26 = vcombine.low %v1113_v24, %v1119_v25  ;;  %v1138_v27 = vcombine.high %v1113_v24, %v1119_v25 }
 0x4e0   : > { %v1145_v30 = vrot.slane %v1137_v26, %v3261_v8  ;;  %v1152_v31 = vrot.slane %v1138_v27, %v3261_v8 }
 0x4e2   : > { %v1153_v32 = vcombine.low %v1129_v28, %v1145_v30  ;;  %v1154_v33 = vcombine.high %v1129_v28, %v1145_v30  ;;  %v1169_v34 = vcombine.low %v1136_v29, %v1152_v31  ;;  %v1170_v35 = vcombine.high %v1136_v29, %v1152_v31  ;;  %v2053_v29 = vld [vmem:[#allocation13 + $0x10] sm:$0xff]  ;;  %v2052_v30 = vld [vmem:[#allocation13 + $0x8] sm:$0xff] }
 0x4e4   : > { %v1161_v36 = vrot.slane %v1153_v32, %v3264_v16  ;;  %v1168_v37 = vrot.slane %v1154_v33, %v3264_v16  ;;  %v1177_v38 = vrot.slane %v1169_v34, %v3264_v16  ;;  %v1184_v40 = vrot.slane %v1170_v35, %v3264_v16 }
 0x4e6   : > { %v1189_v41 = vcombine.low %v1161_v36, %v1168_v37  ;;  %v2332_v42 = vcombine.high %v1161_v36, %v1168_v37  ;;  %v1205_v43 = vcombine.low %v1177_v38, %v1184_v40  ;;  %v2333_v44 = vcombine.high %v1177_v38, %v1184_v40  ;;  %v2051_v40 = vld [vmem:[#allocation13] sm:$0xff] }
 0x4e7   : > { %v2604_v63 = vpop.eup %2603 }
 0x4e8   : > { %v1196_v46 = vrot.slane %v1189_v41, %v3261_v8  ;;  %v1204_v47 = vrot.slane %v2332_v42, %v3261_v8  ;;  %v1212_v48 = vrot.slane %v1205_v43, %v3261_v8  ;;  %v1220_v49 = vrot.slane %v2333_v44, %v3261_v8 }
 0x4e9   : > { %v1605_v3 = vmul.f32 %v2604_v63, %v3344_v14 }
 0x4ea   : > { %v1221_v56 = vcombine.low %v1196_v46, %v1204_v47  ;;  %v1237_v50 = vcombine.low %v1212_v48, %v1220_v49  ;;  %v1222_v39 = vcombine.high %v1196_v46, %v1204_v47  ;;  %v1238_v45 = vcombine.high %v1212_v48, %v1220_v49 }
 0x4ec   : > { %v1229_v53 = vrot.slane %v1221_v56, %v3264_v16  ;;  %v1245_v54 = vrot.slane %v1237_v50, %v3264_v16  ;;  %v1236_v55 = vrot.slane %v1222_v39, %v3264_v16  ;;  %v1252_v57 = vrot.slane %v1238_v45, %v3264_v16 }
 0x4ee   : > { %v1253_v59 = vcombine.low %v1229_v53, %v1245_v54  ;;  %v1254_v60 = vcombine.high %v1229_v53, %v1245_v54  ;;  %v1255_v0 = vcombine.low %v1236_v55, %v1252_v57  ;;  %v1256_v2 = vcombine.high %v1236_v55, %v1252_v57 }
 0x4f0   : > { %2444 = vmatpush3.msra.mxu0 %v1253_v59  ;;  %2449 = vmatpush3.msra.mxu1 %v1254_v60  ;;  %v2348_v59 = vld [vmem:[%s3453_s9] ss:$0 sm:$0xff] }
 0x4f1   : > { %2446 = vmatmul.mubr.msk.f32.vlgmr.msra.gmra.mxu0 %vm1257_vm2, %v1602_v61  ;;  %2451 = vmatmul.mubr.msk.f32.vlgmr.msra.gmra.mxu1 %vm1257_vm2, %v1603_v62 }
 0x4f2   : > { %2453 = vmatprep.subr.mxu0 %v2880_v10  ;;  %2458 = vmatprep.subr.mxu1 %v2880_v10 }
 0x4f3   : > { %2454 = vmatpush3.msra.mxu0 %v1255_v0  ;;  %2459 = vmatpush3.msra.mxu1 %v1256_v2 }
 0x4f4   : > { %2455 = vmatprep.mubr.msk.f32.mxu0 %vm2881_vm1, %v2880_v10  ;;  %2460 = vmatprep.mubr.msk.f32.mxu1 %vm2881_vm1, %v2880_v10 }
 0x4f5   : > { %2456 = vmatmul.mubr.msk.f32.vlgmr.msra.gmra.mxu0 %vm1257_vm2, %v1604_v4  ;;  %2461 = vmatmul.mubr.msk.f32.vlgmr.msra.gmra.mxu1 %vm1257_vm2, %v1605_v3 }
 0x4f6   : > { %2463 = vmatprep.subr.mxu0 %v2880_v10  ;;  %2471 = vmatprep.mubr.msk.f32.mxu0 %vm2881_vm1, %v2880_v10 }
 0x4f7   : > { %2464 = vmatpush3.msra.mxu0 %v2054_v5 }
 0x4f8   : > { %2465 = vmatprep.subr.mxu0 %v2880_v10 }
 0x4f9   : > { %2466 = vmatpush3.msra.mxu0 %v2053_v29 }
 0x4fa   : > { %2467 = vmatprep.subr.mxu0 %v2880_v10 }
 0x4fb   : > { %2468 = vmatpush3.msra.mxu0 %v2052_v30 }
 0x4fc   : > { %2469 = vmatprep.subr.mxu0 %v2880_v10 }
 0x4fd   : > { %2470 = vmatpush3.msra.mxu0 %v2051_v40 }
 0x5b1   : > { %v1675_v6 = vpop.f32.mrf.mxu0  ;;  %v1748_v7 = vpop.f32.mrf.mxu1 }
 0x5b3   : > { %v2447_v9 = vpop.f32.mrf.mxu0  ;;  %v2452_v11 = vpop.f32.mrf.mxu1 }
 0x5b5   : > { %v1821_v12 = vpop.f32.mrf.mxu0  ;;  %v1894_v13 = vpop.f32.mrf.mxu1 }
 0x5b6   : > { %v1898_v14 = vcombine.low %v1675_v6, %v1821_v12  ;;  %v1899_v15 = vcombine.high %v1675_v6, %v1821_v12  ;;  %v1914_v17 = vcombine.low %v1748_v7, %v1894_v13  ;;  %v1915_v18 = vcombine.high %v1748_v7, %v1894_v13 }
 0x5b7   : > { %v2457_v19 = vpop.f32.mrf.mxu0  ;;  %v2462_v20 = vpop.f32.mrf.mxu1 }
 0x5b8   : > { %v1906_v21 = vrot.slane %v1898_v14, %v3261_v8  ;;  %v1913_v22 = vrot.slane %v1899_v15, %v3261_v8  ;;  %v1922_v23 = vrot.slane %v1914_v17, %v3261_v8  ;;  %v1929_v24 = vrot.slane %v1915_v18, %v3261_v8 }
 0x5ba   : > { %v1930_v25 = vcombine.low %v1906_v21, %v1922_v23  ;;  %v1931_v26 = vcombine.high %v1906_v21, %v1922_v23  ;;  %v1946_v27 = vcombine.low %v1913_v22, %v1929_v24  ;;  %v1947_v28 = vcombine.high %v1913_v22, %v1929_v24 }
 0x5bc   : > { %v1938_v31 = vrot.slane %v1930_v25, %v3264_v16  ;;  %v1945_v32 = vrot.slane %v1931_v26, %v3264_v16  ;;  %v1954_v33 = vrot.slane %v1946_v27, %v3264_v16  ;;  %v1961_v34 = vrot.slane %v1947_v28, %v3264_v16 }
 0x5be   : > { %v1966_v35 = vcombine.low %v1938_v31, %v1945_v32  ;;  %v2346_v36 = vcombine.high %v1938_v31, %v1945_v32  ;;  %v1982_v37 = vcombine.low %v1954_v33, %v1961_v34  ;;  %v2347_v38 = vcombine.high %v1954_v33, %v1961_v34 }
 0x5c0   : > { %v1973_v41 = vrot.slane %v1966_v35, %v3261_v8  ;;  %v1981_v42 = vrot.slane %v2346_v36, %v3261_v8  ;;  %v1989_v43 = vrot.slane %v1982_v37, %v3261_v8  ;;  %v1997_v44 = vrot.slane %v2347_v38, %v3261_v8 }
 0x5c2   : > { %v1999_v46 = vcombine.high %v1973_v41, %v1981_v42  ;;  %v2015_v47 = vcombine.high %v1989_v43, %v1997_v44  ;;  %v1998_v48 = vcombine.low %v1973_v41, %v1981_v42  ;;  %v2014_v49 = vcombine.low %v1989_v43, %v1997_v44 }
 0x5c4   : > { %v2013_v56 = vrot.slane %v1999_v46, %v3264_v16  ;;  %v2029_v50 = vrot.slane %v2015_v47, %v3264_v16  ;;  %v2006_v10 = vrot.slane %v1998_v48, %v3264_v16  ;;  %v2022_v39 = vrot.slane %v2014_v49, %v3264_v16 }
 0x5c6   : > { %v2032_v45 = vcombine.low %v2013_v56, %v2029_v50  ;;  %v2031_v51 = vcombine.high %v2006_v10, %v2022_v39  ;;  %v2030_v52 = vcombine.low %v2006_v10, %v2022_v39  ;;  %v2033_v8 = vcombine.high %v2013_v56, %v2029_v50 }
 0x5c8   : > { %2039 = vrot.lane.b32.xlu0 %v2032_v45, %s2887_s23  ;;  %2035 = vrot.lane.b32.xlu1 %v2031_v51, %s2888_s5 }
 0x5cc   : > { %2043 = vrot.lane.b32.xlu1 %v2033_v8, %s2889_s30 }
 0x63a   : > { %v2036_v53 = vpop.permute.xlu1 %2035  ;;  %v2040_v54 = vpop.permute.xlu0 %2039 }
 0x63b   : > { %v2046_v55 = vsel %vm1257_vm2, %v2030_v52, %v2036_v53 }
 0x63c   : > { %v2048_v57 = vsel %vm2047_vm3, %v2046_v55, %v2040_v54 }
 0x63e   : > { %v2044_v16 = vpop.permute.xlu1 %2043 }
 0x63f   : > { %v2050_v58 = vsel %vm2049_vm4, %v2048_v57, %v2044_v16 }
 0x640   : > { %2472 = vmatmul.mubr.msk.f32.vlgmr.msra.gmra.mxu0 %vm509_vm0, %v2050_v58 }
 0x700   : > { %v2131_v60 = vpop.f32.mrf.mxu0 }
 0x701   : > { %v2132_v61 = vadd.f32 %v2348_v59, %v2131_v60 }
 0x702   : > { %v2473_v62 = vpop.f32.mrf.mxu0 }
 0x703   : > { %v2136_v63 = vadd.f32 %v2132_v61, %v3187_v1 }
 0x705   : > { %2137 = vst.msk [vmem:[%s503_s12] sm:$0xff] %vm509_vm0, %v2136_v63 }
 0x706   : > { %2806 = shalt.err (!%p2803_p7)
}
 0x707   : > { %s2807_s26 = scalar_lea.hbm %s2150_s24, 128  ;;  %s2811_s21 = scalar_lea.hbm %s3509_s18, 256 }
 0x708   : > { %p2808_p3 = scmp.ne.s32.totalorder %s2150_s24, %s2807_s26  ;;  %p2812_p6 = scmp.lt.s32.totalorder %s2150_s24, %s3509_s18 }
 0x709   : > { %p2813_p9 = scmp.lt.s32.totalorder %s2811_s21, %s2807_s26 }
 0x70a   : > { %p2809_p12 = pnand %p2808_p3, %p3510_p1 }
 0x70b   : > { %p2814_p2 = por %p2813_p9, %p2812_p6 }
 0x70c   : > { %p2810_p13 = pneg %p2809_p12 }
 0x70e   : > { %p2815_p5 = pnand %p2814_p2, %p2810_p13 }
 0x710   : > { %2818 = shalt.err (!%p2815_p5)
}
 0x711   : > { %2496 = dma.vmem_to_hbm [thread:$0]  (%p3510_p1), %s2153_s1, 128, %s2150_s24, %s2139_s27  }
 0x712 PF: > { %s3511_s5 = sld [smem:[#allocation20_spill]] }
 0x713   : > { %s3512_s30 = sld [smem:[#allocation24_spill]] }
 0x714   : > { %s3513_s11 = sld [smem:[#allocation21_spill]] }
 0x718   : > { %s2164_s22 = sand.u32 1, %s3511_s5  }
 0x719   : > { %p3514_p8 = scmp.ne.s32.totalorder %s3512_s30, 0  ;;  %s2165_s7 = scalar_lea.sflag [#allocation4], %s2164_s22 }
 0x71a   : > { %p3515_p10 = scmp.ge.s32.totalorder %s3513_s11, 2 }
 0x71c   : > { %p2522_p11 = pnand %p3515_p10, %p3514_p8 }
 0x71e   : > { %p2523_p0 = pneg %p2522_p11 }
 0x720   : > { %2852 = dma.done.wait (%p2523_p0), %s2165_s7, 128  }
 0x721   : > { %2854 = vsyncadd (%p2523_p0), %s2165_s7, 4294967168  ;;  %s3516_s16 = sld [smem:[#allocation22_spill]]  ;;  %s3518_s13 = smov %s2861_s14 }
 0x722   : > { %s3517_s12 = sld [smem:[#allocation23_spill]]  ;;  %s3519_s14 = smov %s2865_s15 }
 0x727   : > { %p28_p4 = scmp.ge.s32.totalorder %s3516_s16, 4  }
 0x728   : > { %s3520_s15 = smov %s3517_s12 }
 0x729   :  { %30 = sbr.rel (!%p28_p4) target bundleno = 15 (0xf), region = 145 }
 0x72e   :  { %2170 = vsyncpa [#allocation3], 1 }
 0x72f   :  { %2172 = vsyncpa [#allocation3 + $0x1], 1 }
 0x730   :  { %2173 = vsyncpa [#allocation6], 1 }
 0x731   :  { %2175 = vsyncpa [#allocation6 + $0x1], 1 }
 0x732   :  { %2176 = vsyncpa [#allocation9], 1 }
 0x733   :  { %2177 = vsyncpa [#allocation12], 1 }
 0x734   :  { %2178 = vsyncpa [#allocation4], 1 }
 0x735   :  { %2180 = vsyncpa [#allocation4 + $0x1], 1 }

</bundles_post_ra>
